<compile_context>
chip_gen: v5e
topology: v5e:2x2
jax: 0.10.0
libtpu: 0.0.40
codegen_flags: <defaults>
</compile_context>

<pallas_src>
import jax
import jax.numpy as jnp
from jax.experimental import pallas as pl
from jax.experimental.pallas import tpu as pltpu
import numpy as np


def make_gru_decision_kernel(T, B):
    """Builds the fused GRU-recurrence + decision-projection kernel.

    All non-recurrent work (input->gate projections, decision matmul, bias add,
    output store) is hoisted out of the time loop; only the h @ W_h* matmuls
    and the gate nonlinearities remain on the serial critical path.
    """

    def kernel(emb_ref,                       # (T*B, E)  bf16, time-major flat
               w_ir_ref, w_iz_ref, w_in_ref,  # (E, H)    bf16 each
               w_hr_ref, w_hz_ref, w_hn_ref,  # (H, H)    bf16 each
               w_dec_ref,                     # (H, Vp)   bf16 (lane-padded)
               b_dec_ref,                     # (1, Vp)   f32
               out_ref,                       # (T*B, Vp) f32 (lane-dense)
               h_all_ref):                    # (T*B, H)  f32 VMEM scratch
        emb = emb_ref[...]

        # Hoisted input->gate projections: three batched matmuls (one per gate)
        # so each gate's pre-activation is lane-aligned — no sub-lane slicing.
        gx_r = jnp.dot(emb, w_ir_ref[...], preferred_element_type=jnp.float32)
        gx_z = jnp.dot(emb, w_iz_ref[...], preferred_element_type=jnp.float32)
        gx_n = jnp.dot(emb, w_in_ref[...], preferred_element_type=jnp.float32)

        w_hr = w_hr_ref[...]
        w_hz = w_hz_ref[...]
        w_hn = w_hn_ref[...]
        H = w_hr.shape[0]

        h = jnp.zeros((B, H), jnp.float32)
        for t in range(T):                    # fully unrolled recurrence (T static)
            lo, hi = t * B, (t + 1) * B
            h_b = h.astype(w_hr.dtype)        # bf16 for the MXU push; acc in f32
            gh_r = jnp.dot(h_b, w_hr, preferred_element_type=jnp.float32)
            gh_z = jnp.dot(h_b, w_hz, preferred_element_type=jnp.float32)
            gh_n = jnp.dot(h_b, w_hn, preferred_element_type=jnp.float32)
            r = jax.nn.sigmoid(gx_r[lo:hi] + gh_r)
            z = jax.nn.sigmoid(gx_z[lo:hi] + gh_z)
            n = jnp.tanh(gx_n[lo:hi] + r * gh_n)
            h = (1.0 - z) * n + z * h
            h_all_ref[lo:hi, :] = h

        # Hoisted decision projection: one (T*B, H) x (H, Vp) matmul + bias,
        # stored once into a lane-dense (multiple-of-128-lane) output slab.
        h_all = h_all_ref[...].astype(w_dec_ref.dtype)
        logits = jnp.dot(h_all, w_dec_ref[...],
                         preferred_element_type=jnp.float32) + b_dec_ref[...]
        out_ref[...] = logits

    return kernel


def simple_gru_forward(x, params):
    """x: (B, T) int32 token ids. Returns logits (B, T, V), batch_first."""
    embed_w = params["embed_w"]       # (V, E)
    w_ih = params["w_ih"]             # (3H, E)  PyTorch layout, gate order [r, z, n]
    w_hh = params["w_hh"]             # (3H, H)
    w_dec = params["w_dec"]           # (V, H)
    b_dec = params["b_dec"]           # (V,)

    B, T = x.shape
    V, E = embed_w.shape
    H = w_hh.shape[1]
    Vp = ((V + 127) // 128) * 128     # lane-dense padded output width

    # Time-major flat embedding gather: row t*B + b holds token (b, t).
    # TODO(synk): for large T*E this gather could be fused into the kernel via
    # PrefetchScalarGridSpec + pl.Element row-gather to skip the HBM round-trip.
    ids_flat = jnp.transpose(x).reshape(T * B)
    emb_flat = jnp.take(embed_w, ids_flat, axis=0).astype(jnp.bfloat16)

    bf16 = jnp.bfloat16
    w_ir = jnp.transpose(w_ih[0 * H:1 * H]).astype(bf16)   # (E, H)
    w_iz = jnp.transpose(w_ih[1 * H:2 * H]).astype(bf16)
    w_in = jnp.transpose(w_ih[2 * H:3 * H]).astype(bf16)
    w_hr = jnp.transpose(w_hh[0 * H:1 * H]).astype(bf16)   # (H, H)
    w_hz = jnp.transpose(w_hh[1 * H:2 * H]).astype(bf16)
    w_hn = jnp.transpose(w_hh[2 * H:3 * H]).astype(bf16)

    # Lane-pad the decision weight/bias so the kernel's single output store is
    # a full unmasked vst; padded columns are zero and sliced off below.
    w_dec_p = jnp.zeros((H, Vp), bf16).at[:, :V].set(
        jnp.transpose(w_dec).astype(bf16))
    b_dec_p = jnp.zeros((1, Vp), jnp.float32).at[:, :V].set(
        b_dec.astype(jnp.float32))

    out_flat = pl.pallas_call(
        make_gru_decision_kernel(T, B),
        out_shape=jax.ShapeDtypeStruct((T * B, Vp), jnp.float32),
        in_specs=[pl.BlockSpec(memory_space=pltpu.MemorySpace.VMEM)] * 9,
        out_specs=pl.BlockSpec(memory_space=pltpu.MemorySpace.VMEM),
        scratch_shapes=[pltpu.VMEM((T * B, H), jnp.float32)],
        # TODO(synk): for production shapes (large vocab / long T) switch to a
        # T-chunked grid with BlockSpecs + explicit vmem_limit_bytes (v7x has
        # only 64 MiB VMEM) and a 'parallel' batch axis for the second TC.
    )(emb_flat, w_ir, w_iz, w_in, w_hr, w_hz, w_hn, w_dec_p, b_dec_p)

    # (T*B, Vp) -> (B, T, V): strip lane padding, restore batch_first layout.
    return jnp.transpose(out_flat[:, :V].reshape(T, B, V), (1, 0, 2))


def reference_forward(x, params):
    """Pure-numpy f32 reference matching torch.nn.GRU (bias=False) semantics."""
    embed_w = np.asarray(params["embed_w"], dtype=np.float32)
    w_ih = np.asarray(params["w_ih"], dtype=np.float32)
    w_hh = np.asarray(params["w_hh"], dtype=np.float32)
    w_dec = np.asarray(params["w_dec"], dtype=np.float32)
    b_dec = np.asarray(params["b_dec"], dtype=np.float32)
    x = np.asarray(x)

    B, T = x.shape
    H = w_hh.shape[1]
    V = w_dec.shape[0]

    emb = embed_w[x]                                  # (B, T, E)
    h = np.zeros((B, H), dtype=np.float32)
    outs = np.zeros((B, T, V), dtype=np.float32)

    def sigmoid(v):
        return 1.0 / (1.0 + np.exp(-v))

    for t in range(T):
        x_t = emb[:, t, :]
        gx = x_t @ w_ih.T                             # (B, 3H)
        gh = h @ w_hh.T                               # (B, 3H)
        r = sigmoid(gx[:, 0 * H:1 * H] + gh[:, 0 * H:1 * H])
        z = sigmoid(gx[:, 1 * H:2 * H] + gh[:, 1 * H:2 * H])
        n = np.tanh(gx[:, 2 * H:3 * H] + r * gh[:, 2 * H:3 * H])
        h = (1.0 - z) * n + z * h
        outs[:, t, :] = h @ w_dec.T + b_dec
    return outs


if __name__ == "__main__":
    # Small shapes consistent with the module's forward.
    B, T = 2, 8          # batch, sequence length
    V = 16               # len(le)  (vocab / number of labels)
    E = 32               # embed_size
    H = 32               # hidden_size

    key = jax.random.PRNGKey(0)
    k_emb, k_ih, k_hh, k_dec, k_b, k_x = jax.random.split(key, 6)

    params = {
        "embed_w": 0.1 * jax.random.normal(k_emb, (V, E), jnp.float32),
        "w_ih":    0.1 * jax.random.normal(k_ih, (3 * H, E), jnp.float32),
        "w_hh":    0.1 * jax.random.normal(k_hh, (3 * H, H), jnp.float32),
        "w_dec":   0.1 * jax.random.normal(k_dec, (V, H), jnp.float32),
        "b_dec":   0.1 * jax.random.normal(k_b, (V,), jnp.float32),
    }

    x = jax.random.randint(k_x, (B, T), 0, V, dtype=jnp.int32)

    out = simple_gru_forward(x, params)
    out = jax.block_until_ready(out)

    ref = reference_forward(x, params)
    # bf16 weights/embeddings with f32 accumulation -> ~1e-3 abs error budget.
    np.testing.assert_allclose(np.asarray(out), ref, rtol=2e-2, atol=2e-2)

    print("KERNEL_OK")
</pallas_src>

<mosaic_0001>
module attributes {stable_mosaic.version = 11 : i64} {
  func.func @kernel(%arg0: memref<16x32xbf16, #tpu.memory_space<vmem>>, %arg1: memref<32x32xbf16, #tpu.memory_space<vmem>>, %arg2: memref<32x32xbf16, #tpu.memory_space<vmem>>, %arg3: memref<32x32xbf16, #tpu.memory_space<vmem>>, %arg4: memref<32x32xbf16, #tpu.memory_space<vmem>>, %arg5: memref<32x32xbf16, #tpu.memory_space<vmem>>, %arg6: memref<32x32xbf16, #tpu.memory_space<vmem>>, %arg7: memref<32x128xbf16, #tpu.memory_space<vmem>>, %arg8: memref<1x128xf32, #tpu.memory_space<vmem>>, %arg9: memref<16x128xf32, #tpu.memory_space<vmem>>, %arg10: memref<16x32xf32, #tpu.memory_space<vmem>>) attributes {dimension_semantics = [], scalar_prefetch = 0 : i64, scratch_operands = 1 : i64, tpu.core_type = #tpu.core_type<tc>} {
    %c0 = arith.constant 0 : index
    %c0_0 = arith.constant 0 : index
    %0 = vector.load %arg0[%c0, %c0_0] : memref<16x32xbf16, #tpu.memory_space<vmem>>, vector<16x32xbf16>
    %c0_1 = arith.constant 0 : index
    %c0_2 = arith.constant 0 : index
    %1 = vector.load %arg1[%c0_1, %c0_2] : memref<32x32xbf16, #tpu.memory_space<vmem>>, vector<32x32xbf16>
    %cst = arith.constant dense<0.000000e+00> : vector<16x32xf32>
    %2 = tpu.matmul %0, %1, %cst {dimension_numbers = #tpu.dot_dimension_numbers<[1], [0], [0], [1], [0, 0, 1, 1], [], []>} : vector<16x32xbf16>, vector<32x32xbf16>, vector<16x32xf32> -> vector<16x32xf32>
    %c0_3 = arith.constant 0 : index
    %c0_4 = arith.constant 0 : index
    %3 = vector.load %arg2[%c0_3, %c0_4] : memref<32x32xbf16, #tpu.memory_space<vmem>>, vector<32x32xbf16>
    %cst_5 = arith.constant dense<0.000000e+00> : vector<16x32xf32>
    %4 = tpu.matmul %0, %3, %cst_5 {dimension_numbers = #tpu.dot_dimension_numbers<[1], [0], [0], [1], [0, 0, 1, 1], [], []>} : vector<16x32xbf16>, vector<32x32xbf16>, vector<16x32xf32> -> vector<16x32xf32>
    %c0_6 = arith.constant 0 : index
    %c0_7 = arith.constant 0 : index
    %5 = vector.load %arg3[%c0_6, %c0_7] : memref<32x32xbf16, #tpu.memory_space<vmem>>, vector<32x32xbf16>
    %cst_8 = arith.constant dense<0.000000e+00> : vector<16x32xf32>
    %6 = tpu.matmul %0, %5, %cst_8 {dimension_numbers = #tpu.dot_dimension_numbers<[1], [0], [0], [1], [0, 0, 1, 1], [], []>} : vector<16x32xbf16>, vector<32x32xbf16>, vector<16x32xf32> -> vector<16x32xf32>
    %c0_9 = arith.constant 0 : index
    %c0_10 = arith.constant 0 : index
    %7 = vector.load %arg4[%c0_9, %c0_10] : memref<32x32xbf16, #tpu.memory_space<vmem>>, vector<32x32xbf16>
    %c0_11 = arith.constant 0 : index
    %c0_12 = arith.constant 0 : index
    %8 = vector.load %arg5[%c0_11, %c0_12] : memref<32x32xbf16, #tpu.memory_space<vmem>>, vector<32x32xbf16>
    %c0_13 = arith.constant 0 : index
    %c0_14 = arith.constant 0 : index
    %9 = vector.load %arg6[%c0_13, %c0_14] : memref<32x32xbf16, #tpu.memory_space<vmem>>, vector<32x32xbf16>
    %cst_15 = arith.constant 0.000000e+00 : f32
    %10 = vector.broadcast %cst_15 : f32 to vector<2x32xf32>
    %11 = arith.truncf %10 : vector<2x32xf32> to vector<2x32xbf16>
    %cst_16 = arith.constant dense<0.000000e+00> : vector<2x32xf32>
    %12 = tpu.matmul %11, %7, %cst_16 {dimension_numbers = #tpu.dot_dimension_numbers<[1], [0], [0], [1], [0, 0, 1, 1], [], []>} : vector<2x32xbf16>, vector<32x32xbf16>, vector<2x32xf32> -> vector<2x32xf32>
    %cst_17 = arith.constant dense<0.000000e+00> : vector<2x32xf32>
    %13 = tpu.matmul %11, %8, %cst_17 {dimension_numbers = #tpu.dot_dimension_numbers<[1], [0], [0], [1], [0, 0, 1, 1], [], []>} : vector<2x32xbf16>, vector<32x32xbf16>, vector<2x32xf32> -> vector<2x32xf32>
    %cst_18 = arith.constant dense<0.000000e+00> : vector<2x32xf32>
    %14 = tpu.matmul %11, %9, %cst_18 {dimension_numbers = #tpu.dot_dimension_numbers<[1], [0], [0], [1], [0, 0, 1, 1], [], []>} : vector<2x32xbf16>, vector<32x32xbf16>, vector<2x32xf32> -> vector<2x32xf32>
    %15 = vector.extract_strided_slice %2 {offsets = [0, 0], sizes = [2, 32], strides = [1, 1]} : vector<16x32xf32> to vector<2x32xf32>
    %16 = arith.addf %15, %12 : vector<2x32xf32>
    %17 = arith.negf %16 : vector<2x32xf32>
    %18 = math.exp %17 : vector<2x32xf32>
    %cst_19 = arith.constant 1.000000e+00 : f32
    %19 = vector.broadcast %cst_19 : f32 to vector<2x32xf32>
    %20 = arith.addf %19, %18 : vector<2x32xf32>
    %21 = arith.divf %19, %20 : vector<2x32xf32>
    %22 = vector.extract_strided_slice %4 {offsets = [0, 0], sizes = [2, 32], strides = [1, 1]} : vector<16x32xf32> to vector<2x32xf32>
    %23 = arith.addf %22, %13 : vector<2x32xf32>
    %24 = arith.negf %23 : vector<2x32xf32>
    %25 = math.exp %24 : vector<2x32xf32>
    %cst_20 = arith.constant 1.000000e+00 : f32
    %26 = vector.broadcast %cst_20 : f32 to vector<2x32xf32>
    %27 = arith.addf %26, %25 : vector<2x32xf32>
    %28 = arith.divf %26, %27 : vector<2x32xf32>
    %29 = vector.extract_strided_slice %6 {offsets = [0, 0], sizes = [2, 32], strides = [1, 1]} : vector<16x32xf32> to vector<2x32xf32>
    %30 = arith.mulf %21, %14 : vector<2x32xf32>
    %31 = arith.addf %29, %30 : vector<2x32xf32>
    %32 = math.tanh %31 : vector<2x32xf32>
    %cst_21 = arith.constant 1.000000e+00 : f32
    %33 = vector.broadcast %cst_21 : f32 to vector<2x32xf32>
    %34 = arith.subf %33, %28 : vector<2x32xf32>
    %35 = arith.mulf %34, %32 : vector<2x32xf32>
    %36 = arith.mulf %28, %10 : vector<2x32xf32>
    %37 = arith.addf %35, %36 : vector<2x32xf32>
    %c0_22 = arith.constant 0 : index
    %c0_23 = arith.constant 0 : index
    %38 = vector.load %arg10[%c0_22, %c0_23] : memref<16x32xf32, #tpu.memory_space<vmem>>, vector<2x32xf32>
    tpu.vector_store %arg10[%c0_22, %c0_23], %37 {strides = array<i32>} : memref<16x32xf32, #tpu.memory_space<vmem>>, vector<2x32xf32>,
    %39 = arith.truncf %37 : vector<2x32xf32> to vector<2x32xbf16>
    %cst_24 = arith.constant dense<0.000000e+00> : vector<2x32xf32>
    %40 = tpu.matmul %39, %7, %cst_24 {dimension_numbers = #tpu.dot_dimension_numbers<[1], [0], [0], [1], [0, 0, 1, 1], [], []>} : vector<2x32xbf16>, vector<32x32xbf16>, vector<2x32xf32> -> vector<2x32xf32>
    %cst_25 = arith.constant dense<0.000000e+00> : vector<2x32xf32>
    %41 = tpu.matmul %39, %8, %cst_25 {dimension_numbers = #tpu.dot_dimension_numbers<[1], [0], [0], [1], [0, 0, 1, 1], [], []>} : vector<2x32xbf16>, vector<32x32xbf16>, vector<2x32xf32> -> vector<2x32xf32>
    %cst_26 = arith.constant dense<0.000000e+00> : vector<2x32xf32>
    %42 = tpu.matmul %39, %9, %cst_26 {dimension_numbers = #tpu.dot_dimension_numbers<[1], [0], [0], [1], [0, 0, 1, 1], [], []>} : vector<2x32xbf16>, vector<32x32xbf16>, vector<2x32xf32> -> vector<2x32xf32>
    %43 = vector.extract_strided_slice %2 {offsets = [2, 0], sizes = [2, 32], strides = [1, 1]} : vector<16x32xf32> to vector<2x32xf32>
    %44 = arith.addf %43, %40 : vector<2x32xf32>
    %45 = arith.negf %44 : vector<2x32xf32>
    %46 = math.exp %45 : vector<2x32xf32>
    %cst_27 = arith.constant 1.000000e+00 : f32
    %47 = vector.broadcast %cst_27 : f32 to vector<2x32xf32>
    %48 = arith.addf %47, %46 : vector<2x32xf32>
    %49 = arith.divf %47, %48 : vector<2x32xf32>
    %50 = vector.extract_strided_slice %4 {offsets = [2, 0], sizes = [2, 32], strides = [1, 1]} : vector<16x32xf32> to vector<2x32xf32>
    %51 = arith.addf %50, %41 : vector<2x32xf32>
    %52 = arith.negf %51 : vector<2x32xf32>
    %53 = math.exp %52 : vector<2x32xf32>
    %cst_28 = arith.constant 1.000000e+00 : f32
    %54 = vector.broadcast %cst_28 : f32 to vector<2x32xf32>
    %55 = arith.addf %54, %53 : vector<2x32xf32>
    %56 = arith.divf %54, %55 : vector<2x32xf32>
    %57 = vector.extract_strided_slice %6 {offsets = [2, 0], sizes = [2, 32], strides = [1, 1]} : vector<16x32xf32> to vector<2x32xf32>
    %58 = arith.mulf %49, %42 : vector<2x32xf32>
    %59 = arith.addf %57, %58 : vector<2x32xf32>
    %60 = math.tanh %59 : vector<2x32xf32>
    %cst_29 = arith.constant 1.000000e+00 : f32
    %61 = vector.broadcast %cst_29 : f32 to vector<2x32xf32>
    %62 = arith.subf %61, %56 : vector<2x32xf32>
    %63 = arith.mulf %62, %60 : vector<2x32xf32>
    %64 = arith.mulf %56, %37 : vector<2x32xf32>
    %65 = arith.addf %63, %64 : vector<2x32xf32>
    %c2 = arith.constant 2 : index
    %c0_30 = arith.constant 0 : index
    %66 = vector.load %arg10[%c2, %c0_30] : memref<16x32xf32, #tpu.memory_space<vmem>>, vector<2x32xf32>
    tpu.vector_store %arg10[%c2, %c0_30], %65 {strides = array<i32>} : memref<16x32xf32, #tpu.memory_space<vmem>>, vector<2x32xf32>,
    %67 = arith.truncf %65 : vector<2x32xf32> to vector<2x32xbf16>
    %cst_31 = arith.constant dense<0.000000e+00> : vector<2x32xf32>
    %68 = tpu.matmul %67, %7, %cst_31 {dimension_numbers = #tpu.dot_dimension_numbers<[1], [0], [0], [1], [0, 0, 1, 1], [], []>} : vector<2x32xbf16>, vector<32x32xbf16>, vector<2x32xf32> -> vector<2x32xf32>
    %cst_32 = arith.constant dense<0.000000e+00> : vector<2x32xf32>
    %69 = tpu.matmul %67, %8, %cst_32 {dimension_numbers = #tpu.dot_dimension_numbers<[1], [0], [0], [1], [0, 0, 1, 1], [], []>} : vector<2x32xbf16>, vector<32x32xbf16>, vector<2x32xf32> -> vector<2x32xf32>
    %cst_33 = arith.constant dense<0.000000e+00> : vector<2x32xf32>
    %70 = tpu.matmul %67, %9, %cst_33 {dimension_numbers = #tpu.dot_dimension_numbers<[1], [0], [0], [1], [0, 0, 1, 1], [], []>} : vector<2x32xbf16>, vector<32x32xbf16>, vector<2x32xf32> -> vector<2x32xf32>
    %71 = vector.extract_strided_slice %2 {offsets = [4, 0], sizes = [2, 32], strides = [1, 1]} : vector<16x32xf32> to vector<2x32xf32>
    %72 = arith.addf %71, %68 : vector<2x32xf32>
    %73 = arith.negf %72 : vector<2x32xf32>
    %74 = math.exp %73 : vector<2x32xf32>
    %cst_34 = arith.constant 1.000000e+00 : f32
    %75 = vector.broadcast %cst_34 : f32 to vector<2x32xf32>
    %76 = arith.addf %75, %74 : vector<2x32xf32>
    %77 = arith.divf %75, %76 : vector<2x32xf32>
    %78 = vector.extract_strided_slice %4 {offsets = [4, 0], sizes = [2, 32], strides = [1, 1]} : vector<16x32xf32> to vector<2x32xf32>
    %79 = arith.addf %78, %69 : vector<2x32xf32>
    %80 = arith.negf %79 : vector<2x32xf32>
    %81 = math.exp %80 : vector<2x32xf32>
    %cst_35 = arith.constant 1.000000e+00 : f32
    %82 = vector.broadcast %cst_35 : f32 to vector<2x32xf32>
    %83 = arith.addf %82, %81 : vector<2x32xf32>
    %84 = arith.divf %82, %83 : vector<2x32xf32>
    %85 = vector.extract_strided_slice %6 {offsets = [4, 0], sizes = [2, 32], strides = [1, 1]} : vector<16x32xf32> to vector<2x32xf32>
    %86 = arith.mulf %77, %70 : vector<2x32xf32>
    %87 = arith.addf %85, %86 : vector<2x32xf32>
    %88 = math.tanh %87 : vector<2x32xf32>
    %cst_36 = arith.constant 1.000000e+00 : f32
    %89 = vector.broadcast %cst_36 : f32 to vector<2x32xf32>
    %90 = arith.subf %89, %84 : vector<2x32xf32>
    %91 = arith.mulf %90, %88 : vector<2x32xf32>
    %92 = arith.mulf %84, %65 : vector<2x32xf32>
    %93 = arith.addf %91, %92 : vector<2x32xf32>
    %c4 = arith.constant 4 : index
    %c0_37 = arith.constant 0 : index
    %94 = vector.load %arg10[%c4, %c0_37] : memref<16x32xf32, #tpu.memory_space<vmem>>, vector<2x32xf32>
    tpu.vector_store %arg10[%c4, %c0_37], %93 {strides = array<i32>} : memref<16x32xf32, #tpu.memory_space<vmem>>, vector<2x32xf32>,
    %95 = arith.truncf %93 : vector<2x32xf32> to vector<2x32xbf16>
    %cst_38 = arith.constant dense<0.000000e+00> : vector<2x32xf32>
    %96 = tpu.matmul %95, %7, %cst_38 {dimension_numbers = #tpu.dot_dimension_numbers<[1], [0], [0], [1], [0, 0, 1, 1], [], []>} : vector<2x32xbf16>, vector<32x32xbf16>, vector<2x32xf32> -> vector<2x32xf32>
    %cst_39 = arith.constant dense<0.000000e+00> : vector<2x32xf32>
    %97 = tpu.matmul %95, %8, %cst_39 {dimension_numbers = #tpu.dot_dimension_numbers<[1], [0], [0], [1], [0, 0, 1, 1], [], []>} : vector<2x32xbf16>, vector<32x32xbf16>, vector<2x32xf32> -> vector<2x32xf32>
    %cst_40 = arith.constant dense<0.000000e+00> : vector<2x32xf32>
    %98 = tpu.matmul %95, %9, %cst_40 {dimension_numbers = #tpu.dot_dimension_numbers<[1], [0], [0], [1], [0, 0, 1, 1], [], []>} : vector<2x32xbf16>, vector<32x32xbf16>, vector<2x32xf32> -> vector<2x32xf32>
    %99 = vector.extract_strided_slice %2 {offsets = [6, 0], sizes = [2, 32], strides = [1, 1]} : vector<16x32xf32> to vector<2x32xf32>
    %100 = arith.addf %99, %96 : vector<2x32xf32>
    %101 = arith.negf %100 : vector<2x32xf32>
    %102 = math.exp %101 : vector<2x32xf32>
    %cst_41 = arith.constant 1.000000e+00 : f32
    %103 = vector.broadcast %cst_41 : f32 to vector<2x32xf32>
    %104 = arith.addf %103, %102 : vector<2x32xf32>
    %105 = arith.divf %103, %104 : vector<2x32xf32>
    %106 = vector.extract_strided_slice %4 {offsets = [6, 0], sizes = [2, 32], strides = [1, 1]} : vector<16x32xf32> to vector<2x32xf32>
    %107 = arith.addf %106, %97 : vector<2x32xf32>
    %108 = arith.negf %107 : vector<2x32xf32>
    %109 = math.exp %108 : vector<2x32xf32>
    %cst_42 = arith.constant 1.000000e+00 : f32
    %110 = vector.broadcast %cst_42 : f32 to vector<2x32xf32>
    %111 = arith.addf %110, %109 : vector<2x32xf32>
    %112 = arith.divf %110, %111 : vector<2x32xf32>
    %113 = vector.extract_strided_slice %6 {offsets = [6, 0], sizes = [2, 32], strides = [1, 1]} : vector<16x32xf32> to vector<2x32xf32>
    %114 = arith.mulf %105, %98 : vector<2x32xf32>
    %115 = arith.addf %113, %114 : vector<2x32xf32>
    %116 = math.tanh %115 : vector<2x32xf32>
    %cst_43 = arith.constant 1.000000e+00 : f32
    %117 = vector.broadcast %cst_43 : f32 to vector<2x32xf32>
    %118 = arith.subf %117, %112 : vector<2x32xf32>
    %119 = arith.mulf %118, %116 : vector<2x32xf32>
    %120 = arith.mulf %112, %93 : vector<2x32xf32>
    %121 = arith.addf %119, %120 : vector<2x32xf32>
    %c6 = arith.constant 6 : index
    %c0_44 = arith.constant 0 : index
    %122 = vector.load %arg10[%c6, %c0_44] : memref<16x32xf32, #tpu.memory_space<vmem>>, vector<2x32xf32>
    tpu.vector_store %arg10[%c6, %c0_44], %121 {strides = array<i32>} : memref<16x32xf32, #tpu.memory_space<vmem>>, vector<2x32xf32>,
    %123 = arith.truncf %121 : vector<2x32xf32> to vector<2x32xbf16>
    %cst_45 = arith.constant dense<0.000000e+00> : vector<2x32xf32>
    %124 = tpu.matmul %123, %7, %cst_45 {dimension_numbers = #tpu.dot_dimension_numbers<[1], [0], [0], [1], [0, 0, 1, 1], [], []>} : vector<2x32xbf16>, vector<32x32xbf16>, vector<2x32xf32> -> vector<2x32xf32>
    %cst_46 = arith.constant dense<0.000000e+00> : vector<2x32xf32>
    %125 = tpu.matmul %123, %8, %cst_46 {dimension_numbers = #tpu.dot_dimension_numbers<[1], [0], [0], [1], [0, 0, 1, 1], [], []>} : vector<2x32xbf16>, vector<32x32xbf16>, vector<2x32xf32> -> vector<2x32xf32>
    %cst_47 = arith.constant dense<0.000000e+00> : vector<2x32xf32>
    %126 = tpu.matmul %123, %9, %cst_47 {dimension_numbers = #tpu.dot_dimension_numbers<[1], [0], [0], [1], [0, 0, 1, 1], [], []>} : vector<2x32xbf16>, vector<32x32xbf16>, vector<2x32xf32> -> vector<2x32xf32>
    %127 = vector.extract_strided_slice %2 {offsets = [8, 0], sizes = [2, 32], strides = [1, 1]} : vector<16x32xf32> to vector<2x32xf32>
    %128 = arith.addf %127, %124 : vector<2x32xf32>
    %129 = arith.negf %128 : vector<2x32xf32>
    %130 = math.exp %129 : vector<2x32xf32>
    %cst_48 = arith.constant 1.000000e+00 : f32
    %131 = vector.broadcast %cst_48 : f32 to vector<2x32xf32>
    %132 = arith.addf %131, %130 : vector<2x32xf32>
    %133 = arith.divf %131, %132 : vector<2x32xf32>
    %134 = vector.extract_strided_slice %4 {offsets = [8, 0], sizes = [2, 32], strides = [1, 1]} : vector<16x32xf32> to vector<2x32xf32>
    %135 = arith.addf %134, %125 : vector<2x32xf32>
    %136 = arith.negf %135 : vector<2x32xf32>
    %137 = math.exp %136 : vector<2x32xf32>
    %cst_49 = arith.constant 1.000000e+00 : f32
    %138 = vector.broadcast %cst_49 : f32 to vector<2x32xf32>
    %139 = arith.addf %138, %137 : vector<2x32xf32>
    %140 = arith.divf %138, %139 : vector<2x32xf32>
    %141 = vector.extract_strided_slice %6 {offsets = [8, 0], sizes = [2, 32], strides = [1, 1]} : vector<16x32xf32> to vector<2x32xf32>
    %142 = arith.mulf %133, %126 : vector<2x32xf32>
    %143 = arith.addf %141, %142 : vector<2x32xf32>
    %144 = math.tanh %143 : vector<2x32xf32>
    %cst_50 = arith.constant 1.000000e+00 : f32
    %145 = vector.broadcast %cst_50 : f32 to vector<2x32xf32>
    %146 = arith.subf %145, %140 : vector<2x32xf32>
    %147 = arith.mulf %146, %144 : vector<2x32xf32>
    %148 = arith.mulf %140, %121 : vector<2x32xf32>
    %149 = arith.addf %147, %148 : vector<2x32xf32>
    %c8 = arith.constant 8 : index
    %c0_51 = arith.constant 0 : index
    %150 = vector.load %arg10[%c8, %c0_51] : memref<16x32xf32, #tpu.memory_space<vmem>>, vector<2x32xf32>
    tpu.vector_store %arg10[%c8, %c0_51], %149 {strides = array<i32>} : memref<16x32xf32, #tpu.memory_space<vmem>>, vector<2x32xf32>,
    %151 = arith.truncf %149 : vector<2x32xf32> to vector<2x32xbf16>
    %cst_52 = arith.constant dense<0.000000e+00> : vector<2x32xf32>
    %152 = tpu.matmul %151, %7, %cst_52 {dimension_numbers = #tpu.dot_dimension_numbers<[1], [0], [0], [1], [0, 0, 1, 1], [], []>} : vector<2x32xbf16>, vector<32x32xbf16>, vector<2x32xf32> -> vector<2x32xf32>
    %cst_53 = arith.constant dense<0.000000e+00> : vector<2x32xf32>
    %153 = tpu.matmul %151, %8, %cst_53 {dimension_numbers = #tpu.dot_dimension_numbers<[1], [0], [0], [1], [0, 0, 1, 1], [], []>} : vector<2x32xbf16>, vector<32x32xbf16>, vector<2x32xf32> -> vector<2x32xf32>
    %cst_54 = arith.constant dense<0.000000e+00> : vector<2x32xf32>
    %154 = tpu.matmul %151, %9, %cst_54 {dimension_numbers = #tpu.dot_dimension_numbers<[1], [0], [0], [1], [0, 0, 1, 1], [], []>} : vector<2x32xbf16>, vector<32x32xbf16>, vector<2x32xf32> -> vector<2x32xf32>
    %155 = vector.extract_strided_slice %2 {offsets = [10, 0], sizes = [2, 32], strides = [1, 1]} : vector<16x32xf32> to vector<2x32xf32>
    %156 = arith.addf %155, %152 : vector<2x32xf32>
    %157 = arith.negf %156 : vector<2x32xf32>
    %158 = math.exp %157 : vector<2x32xf32>
    %cst_55 = arith.constant 1.000000e+00 : f32
    %159 = vector.broadcast %cst_55 : f32 to vector<2x32xf32>
    %160 = arith.addf %159, %158 : vector<2x32xf32>
    %161 = arith.divf %159, %160 : vector<2x32xf32>
    %162 = vector.extract_strided_slice %4 {offsets = [10, 0], sizes = [2, 32], strides = [1, 1]} : vector<16x32xf32> to vector<2x32xf32>
    %163 = arith.addf %162, %153 : vector<2x32xf32>
    %164 = arith.negf %163 : vector<2x32xf32>
    %165 = math.exp %164 : vector<2x32xf32>
    %cst_56 = arith.constant 1.000000e+00 : f32
    %166 = vector.broadcast %cst_56 : f32 to vector<2x32xf32>
    %167 = arith.addf %166, %165 : vector<2x32xf32>
    %168 = arith.divf %166, %167 : vector<2x32xf32>
    %169 = vector.extract_strided_slice %6 {offsets = [10, 0], sizes = [2, 32], strides = [1, 1]} : vector<16x32xf32> to vector<2x32xf32>
    %170 = arith.mulf %161, %154 : vector<2x32xf32>
    %171 = arith.addf %169, %170 : vector<2x32xf32>
    %172 = math.tanh %171 : vector<2x32xf32>
    %cst_57 = arith.constant 1.000000e+00 : f32
    %173 = vector.broadcast %cst_57 : f32 to vector<2x32xf32>
    %174 = arith.subf %173, %168 : vector<2x32xf32>
    %175 = arith.mulf %174, %172 : vector<2x32xf32>
    %176 = arith.mulf %168, %149 : vector<2x32xf32>
    %177 = arith.addf %175, %176 : vector<2x32xf32>
    %c10 = arith.constant 10 : index
    %c0_58 = arith.constant 0 : index
    %178 = vector.load %arg10[%c10, %c0_58] : memref<16x32xf32, #tpu.memory_space<vmem>>, vector<2x32xf32>
    tpu.vector_store %arg10[%c10, %c0_58], %177 {strides = array<i32>} : memref<16x32xf32, #tpu.memory_space<vmem>>, vector<2x32xf32>,
    %179 = arith.truncf %177 : vector<2x32xf32> to vector<2x32xbf16>
    %cst_59 = arith.constant dense<0.000000e+00> : vector<2x32xf32>
    %180 = tpu.matmul %179, %7, %cst_59 {dimension_numbers = #tpu.dot_dimension_numbers<[1], [0], [0], [1], [0, 0, 1, 1], [], []>} : vector<2x32xbf16>, vector<32x32xbf16>, vector<2x32xf32> -> vector<2x32xf32>
    %cst_60 = arith.constant dense<0.000000e+00> : vector<2x32xf32>
    %181 = tpu.matmul %179, %8, %cst_60 {dimension_numbers = #tpu.dot_dimension_numbers<[1], [0], [0], [1], [0, 0, 1, 1], [], []>} : vector<2x32xbf16>, vector<32x32xbf16>, vector<2x32xf32> -> vector<2x32xf32>
    %cst_61 = arith.constant dense<0.000000e+00> : vector<2x32xf32>
    %182 = tpu.matmul %179, %9, %cst_61 {dimension_numbers = #tpu.dot_dimension_numbers<[1], [0], [0], [1], [0, 0, 1, 1], [], []>} : vector<2x32xbf16>, vector<32x32xbf16>, vector<2x32xf32> -> vector<2x32xf32>
    %183 = vector.extract_strided_slice %2 {offsets = [12, 0], sizes = [2, 32], strides = [1, 1]} : vector<16x32xf32> to vector<2x32xf32>
    %184 = arith.addf %183, %180 : vector<2x32xf32>
    %185 = arith.negf %184 : vector<2x32xf32>
    %186 = math.exp %185 : vector<2x32xf32>
    %cst_62 = arith.constant 1.000000e+00 : f32
    %187 = vector.broadcast %cst_62 : f32 to vector<2x32xf32>
    %188 = arith.addf %187, %186 : vector<2x32xf32>
    %189 = arith.divf %187, %188 : vector<2x32xf32>
    %190 = vector.extract_strided_slice %4 {offsets = [12, 0], sizes = [2, 32], strides = [1, 1]} : vector<16x32xf32> to vector<2x32xf32>
    %191 = arith.addf %190, %181 : vector<2x32xf32>
    %192 = arith.negf %191 : vector<2x32xf32>
    %193 = math.exp %192 : vector<2x32xf32>
    %cst_63 = arith.constant 1.000000e+00 : f32
    %194 = vector.broadcast %cst_63 : f32 to vector<2x32xf32>
    %195 = arith.addf %194, %193 : vector<2x32xf32>
    %196 = arith.divf %194, %195 : vector<2x32xf32>
    %197 = vector.extract_strided_slice %6 {offsets = [12, 0], sizes = [2, 32], strides = [1, 1]} : vector<16x32xf32> to vector<2x32xf32>
    %198 = arith.mulf %189, %182 : vector<2x32xf32>
    %199 = arith.addf %197, %198 : vector<2x32xf32>
    %200 = math.tanh %199 : vector<2x32xf32>
    %cst_64 = arith.constant 1.000000e+00 : f32
    %201 = vector.broadcast %cst_64 : f32 to vector<2x32xf32>
    %202 = arith.subf %201, %196 : vector<2x32xf32>
    %203 = arith.mulf %202, %200 : vector<2x32xf32>
    %204 = arith.mulf %196, %177 : vector<2x32xf32>
    %205 = arith.addf %203, %204 : vector<2x32xf32>
    %c12 = arith.constant 12 : index
    %c0_65 = arith.constant 0 : index
    %206 = vector.load %arg10[%c12, %c0_65] : memref<16x32xf32, #tpu.memory_space<vmem>>, vector<2x32xf32>
    tpu.vector_store %arg10[%c12, %c0_65], %205 {strides = array<i32>} : memref<16x32xf32, #tpu.memory_space<vmem>>, vector<2x32xf32>,
    %207 = arith.truncf %205 : vector<2x32xf32> to vector<2x32xbf16>
    %cst_66 = arith.constant dense<0.000000e+00> : vector<2x32xf32>
    %208 = tpu.matmul %207, %7, %cst_66 {dimension_numbers = #tpu.dot_dimension_numbers<[1], [0], [0], [1], [0, 0, 1, 1], [], []>} : vector<2x32xbf16>, vector<32x32xbf16>, vector<2x32xf32> -> vector<2x32xf32>
    %cst_67 = arith.constant dense<0.000000e+00> : vector<2x32xf32>
    %209 = tpu.matmul %207, %8, %cst_67 {dimension_numbers = #tpu.dot_dimension_numbers<[1], [0], [0], [1], [0, 0, 1, 1], [], []>} : vector<2x32xbf16>, vector<32x32xbf16>, vector<2x32xf32> -> vector<2x32xf32>
    %cst_68 = arith.constant dense<0.000000e+00> : vector<2x32xf32>
    %210 = tpu.matmul %207, %9, %cst_68 {dimension_numbers = #tpu.dot_dimension_numbers<[1], [0], [0], [1], [0, 0, 1, 1], [], []>} : vector<2x32xbf16>, vector<32x32xbf16>, vector<2x32xf32> -> vector<2x32xf32>
    %211 = vector.extract_strided_slice %2 {offsets = [14, 0], sizes = [2, 32], strides = [1, 1]} : vector<16x32xf32> to vector<2x32xf32>
    %212 = arith.addf %211, %208 : vector<2x32xf32>
    %213 = arith.negf %212 : vector<2x32xf32>
    %214 = math.exp %213 : vector<2x32xf32>
    %cst_69 = arith.constant 1.000000e+00 : f32
    %215 = vector.broadcast %cst_69 : f32 to vector<2x32xf32>
    %216 = arith.addf %215, %214 : vector<2x32xf32>
    %217 = arith.divf %215, %216 : vector<2x32xf32>
    %218 = vector.extract_strided_slice %4 {offsets = [14, 0], sizes = [2, 32], strides = [1, 1]} : vector<16x32xf32> to vector<2x32xf32>
    %219 = arith.addf %218, %209 : vector<2x32xf32>
    %220 = arith.negf %219 : vector<2x32xf32>
    %221 = math.exp %220 : vector<2x32xf32>
    %cst_70 = arith.constant 1.000000e+00 : f32
    %222 = vector.broadcast %cst_70 : f32 to vector<2x32xf32>
    %223 = arith.addf %222, %221 : vector<2x32xf32>
    %224 = arith.divf %222, %223 : vector<2x32xf32>
    %225 = vector.extract_strided_slice %6 {offsets = [14, 0], sizes = [2, 32], strides = [1, 1]} : vector<16x32xf32> to vector<2x32xf32>
    %226 = arith.mulf %217, %210 : vector<2x32xf32>
    %227 = arith.addf %225, %226 : vector<2x32xf32>
    %228 = math.tanh %227 : vector<2x32xf32>
    %cst_71 = arith.constant 1.000000e+00 : f32
    %229 = vector.broadcast %cst_71 : f32 to vector<2x32xf32>
    %230 = arith.subf %229, %224 : vector<2x32xf32>
    %231 = arith.mulf %230, %228 : vector<2x32xf32>
    %232 = arith.mulf %224, %205 : vector<2x32xf32>
    %233 = arith.addf %231, %232 : vector<2x32xf32>
    %c14 = arith.constant 14 : index
    %c0_72 = arith.constant 0 : index
    %234 = vector.load %arg10[%c14, %c0_72] : memref<16x32xf32, #tpu.memory_space<vmem>>, vector<2x32xf32>
    tpu.vector_store %arg10[%c14, %c0_72], %233 {strides = array<i32>} : memref<16x32xf32, #tpu.memory_space<vmem>>, vector<2x32xf32>,
    %c0_73 = arith.constant 0 : index
    %c0_74 = arith.constant 0 : index
    %235 = vector.load %arg10[%c0_73, %c0_74] : memref<16x32xf32, #tpu.memory_space<vmem>>, vector<16x32xf32>
    %236 = arith.truncf %235 : vector<16x32xf32> to vector<16x32xbf16>
    %c0_75 = arith.constant 0 : index
    %c0_76 = arith.constant 0 : index
    %237 = vector.load %arg7[%c0_75, %c0_76] : memref<32x128xbf16, #tpu.memory_space<vmem>>, vector<32x128xbf16>
    %cst_77 = arith.constant dense<0.000000e+00> : vector<16x128xf32>
    %238 = tpu.matmul %236, %237, %cst_77 {dimension_numbers = #tpu.dot_dimension_numbers<[1], [0], [0], [1], [0, 0, 1, 1], [], []>} : vector<16x32xbf16>, vector<32x128xbf16>, vector<16x128xf32> -> vector<16x128xf32>
    %c0_78 = arith.constant 0 : index
    %c0_79 = arith.constant 0 : index
    %239 = vector.load %arg8[%c0_78, %c0_79] : memref<1x128xf32, #tpu.memory_space<vmem>>, vector<1x128xf32>
    %240 = vector.broadcast %239 : vector<1x128xf32> to vector<16x128xf32>
    %241 = arith.addf %238, %240 : vector<16x128xf32>
    %c0_80 = arith.constant 0 : index
    %c0_81 = arith.constant 0 : index
    %242 = vector.load %arg9[%c0_80, %c0_81] : memref<16x128xf32, #tpu.memory_space<vmem>>, vector<16x128xf32>
    tpu.vector_store %arg9[%c0_80, %c0_81], %241 {strides = array<i32>} : memref<16x128xf32, #tpu.memory_space<vmem>>, vector<16x128xf32>,
    return
  }
}

</mosaic_0001>

<bundles_post_ra>
// kernel: tpu_custom_call.1
= control target key start
LH: loop header
LB: loop body
LE: loop exit
PB: predicated region body
PF: predicated region fallthrough
CT: control target
= control target key end

     0   :  { %14 = vsyncpa [#allocation4], 0  ;;  %s1917_s0 = inlined_call_operand.hbm [shape: bf16[16,32], index: 0, kind: input, shape index: {}]   ;;  %s1918_s1 = inlined_call_operand.hbm [shape: bf16[32,32], index: 1, kind: input, shape index: {}]   ;;  %s1919_s2 = inlined_call_operand.hbm [shape: bf16[32,32], index: 2, kind: input, shape index: {}]   ;;  %s1920_s3 = inlined_call_operand.hbm [shape: bf16[32,32], index: 3, kind: input, shape index: {}]   ;;  %s1921_s4 = inlined_call_operand.hbm [shape: bf16[32,32], index: 4, kind: input, shape index: {}]   ;;  %s1922_s5 = inlined_call_operand.hbm [shape: bf16[32,32], index: 5, kind: input, shape index: {}]   ;;  %s1923_s6 = inlined_call_operand.hbm [shape: bf16[32,32], index: 6, kind: input, shape index: {}]   ;;  %s1924_s7 = inlined_call_operand.hbm [shape: bf16[32,128], index: 7, kind: input, shape index: {}]   ;;  %s1925_s8 = inlined_call_operand.vmem [shape: f32[1,128], index: 8, kind: input, shape index: {}]   ;;  %s1926_s9 = inlined_call_operand.hbm [shape: f32[16,128], index: 9, kind: output, shape index: {}]  }
   0x1   :  { %15 = vsyncpa [#allocation7], 0 }
   0x2   :  { %16 = vsyncpa [#allocation10], 0 }
   0x3   :  { %17 = vsyncpa [#allocation13], 0 }
   0x4   :  { %18 = vsyncpa [#allocation16], 0 }
   0x5   :  { %19 = vsyncpa [#allocation5], 0  ;;  %s37_s11 = sshll.u32 %s1918_s1, 4  ;;  %s1628_s12 = smov [#allocation6]   ;;  %s38_s11 = int_to_ptr.hbm [resolvable:$true] %s37_s11 }
   0x6   :  { %s39_s13 = sshll.u32 %s1628_s12, 4  ;;  %s63_s16 = sshll.u32 %s1920_s3, 4  ;;  %s40_s13 = int_to_ptr.vmem [resolvable:$true] %s39_s13  ;;  %s64_s16 = int_to_ptr.hbm [resolvable:$true] %s63_s16 }
   0x7   :  { %s1629_s17 = smov 64   ;;  %s1630_s18 = smov 4  }
   0x8   :  { %45 = dma.hbm_to_vmem [thread:$0]  %s38_s11, 256, %s40_s13, [#allocation7], %s1629_s17, %s1629_s17, %s1630_s18  }
   0x9   :  { %s1631_s19 = smov [#allocation9]   ;;  %s89_s1 = sshll.u32 %s1922_s5, 4  ;;  %s90_s1 = int_to_ptr.hbm [resolvable:$true] %s89_s1 }
   0xa   :  { %s65_s20 = sshll.u32 %s1631_s19, 4  ;;  %s24_s24 = sshll.u32 %s1917_s0, 4  ;;  %s66_s20 = int_to_ptr.vmem [resolvable:$true] %s65_s20  ;;  %s25_s24 = int_to_ptr.hbm [resolvable:$true] %s24_s24 }
   0xb   :  { %71 = dma.hbm_to_vmem [thread:$0]  %s64_s16, 256, %s66_s20, [#allocation10], %s1629_s17, %s1629_s17, %s1630_s18  }
   0xc   :  { %s1632_s25 = smov [#allocation12]   ;;  %s1633_s27 = smov [#allocation3]  }
   0xd   :  { %s91_s26 = sshll.u32 %s1632_s25, 4  ;;  %s26_s5 = sshll.u32 %s1633_s27, 4  ;;  %s92_s26 = int_to_ptr.vmem [resolvable:$true] %s91_s26  ;;  %s27_s5 = int_to_ptr.vmem [resolvable:$true] %s26_s5 }
   0xe   :  { %97 = dma.hbm_to_vmem [thread:$0]  %s90_s1, 256, %s92_s26, [#allocation13], %s1629_s17, %s1629_s17, %s1630_s18  }
   0xf   :  { %s50_s30 = sshll.u32 %s1919_s2, 4  ;;  %s76_s11 = sshll.u32 %s1921_s4, 4  ;;  %s51_s30 = int_to_ptr.hbm [resolvable:$true] %s50_s30  ;;  %s77_s11 = int_to_ptr.hbm [resolvable:$true] %s76_s11 }
  0x10   :  { %32 = dma.hbm_to_vmem [thread:$0]  %s25_s24, 128, %s27_s5, [#allocation4], %s1629_s17, %s1629_s17, %s1630_s18  }
  0x11   :  { %s1634_s12 = smov [#allocation8]   ;;  %s1635_s14 = smov [#allocation11]  }
  0x12   :  { %s52_s13 = sshll.u32 %s1634_s12, 4  ;;  %s78_s2 = sshll.u32 %s1635_s14, 4  ;;  %s53_s13 = int_to_ptr.vmem [resolvable:$true] %s52_s13  ;;  %s79_s2 = int_to_ptr.vmem [resolvable:$true] %s78_s2 }
  0x13   :  { %58 = dma.hbm_to_vmem [thread:$0]  %s51_s30, 256, %s53_s13, [#allocation7], %s1629_s17, %s1629_s17, %s1630_s18  }
  0x14   :  { %s102_s19 = sshll.u32 %s1923_s6, 4  ;;  %s115_s21 = sshll.u32 %s1924_s7, 4  ;;  %s103_s19 = int_to_ptr.hbm [resolvable:$true] %s102_s19  ;;  %s116_s21 = int_to_ptr.hbm [resolvable:$true] %s115_s21 }
  0x15   :  { %84 = dma.hbm_to_vmem [thread:$0]  %s77_s11, 256, %s79_s2, [#allocation10], %s1629_s17, %s1629_s17, %s1630_s18  }
  0x16   :  { %s1636_s22 = smov [#allocation14]   ;;  %s1637_s3 = smov [#allocation15]  }
  0x17   :  { %s104_s1 = sshll.u32 %s1636_s22, 4  ;;  %s117_s6 = sshll.u32 %s1637_s3, 4  ;;  %s105_s1 = int_to_ptr.vmem [resolvable:$true] %s104_s1  ;;  %s118_s6 = int_to_ptr.vmem [resolvable:$true] %s117_s6 }
  0x18   :  { %110 = dma.hbm_to_vmem [thread:$0]  %s103_s19, 256, %s105_s1, [#allocation13], %s1629_s17, %s1629_s17, %s1630_s18  }
  0x19   :  { %123 = dma.hbm_to_vmem [thread:$0]  %s116_s21, 256, %s118_s6, [#allocation16], %s1629_s17, %s1629_s17, %s1630_s18  }
  0x1a   :  { %1616 = dma.done.wait [#allocation4], 128  }
  0x1b   :  { %1617 = vsyncadd [#allocation4], 4294967168 }
  0x1c   :  { %1618 = dma.done.wait [#allocation7], 512  }
  0x1d   :  { %1619 = vsyncadd [#allocation7], 4294966784 }
  0x1e   :  { %1620 = dma.done.wait [#allocation10], 512  }
  0x1f   :  { %1621 = vsyncadd [#allocation10], 4294966784 }
  0x20   :  { %1622 = dma.done.wait [#allocation13], 512  }
  0x21   :  { %1623 = vsyncadd [#allocation13], 4294966784 }
  0x22   :  { %1624 = dma.done.wait [#allocation16], 256  }
  0x23   :  { %1625 = vsyncadd [#allocation16], 4294967040  ;;  %v1292_v0 = vld [vmem:[#allocation6 + $0x8] sm:$0xff]  ;;  %v1740_v1 = vld [vmem:[#allocation11 + $0x8] sm:$0xff]  ;;  %vm182_vm0 = vcmask 261120   ;;  %v1638_v12 = vmov 0  }
  0x24   :  { %192 = vmatpush.bf16.msra.mxu0 %v1292_v0  ;;  %293 = vmatpush.bf16.msra.mxu3 %v1740_v1  ;;  %v1291_v2 = vld [vmem:[#allocation6] sm:$0xff]  ;;  %v1743_v3 = vld [vmem:[#allocation11] sm:$0xff]  ;;  %v1294_v4 = vld [vmem:[#allocation8 + $0x8] sm:$0xff]  ;;  %vm397_vm9 = vcmask 254976   ;;  %s1639_s18 = smov [#allocation17]   ;;  %s1172_s26 = sshll.u32 %s1926_s9, 4  ;;  %s1173_s26 = int_to_ptr.hbm [resolvable:$true] %s1172_s26 }
  0x25   :  { %v1745_v5 = vld [vmem:[#allocation12 + $0x8] sm:$0xff]  ;;  %222 = vmatpush.bf16.msra.mxu1 %v1294_v4  ;;  %v1293_v7 = vld [vmem:[#allocation8] sm:$0xff]  ;;  %v1290_v8 = vld [vmem:[#allocation3] sm:$0xff]  ;;  %s1170_s23 = sshll.u32 %s1639_s18, 4  ;;  %s1640_s27 = smov 128   ;;  %s1171_s23 = int_to_ptr.vmem [resolvable:$true] %s1170_s23 }
  0x26   :  { %v1296_v6 = vld [vmem:[#allocation9 + $0x8] sm:$0xff]  ;;  %v1748_v9 = vld [vmem:[#allocation14 + $0x8] sm:$0xff]  ;;  %v1295_v10 = vld [vmem:[#allocation9] sm:$0xff]  ;;  %s1641_s5 = smov 8  }
  0x27   :  { %252 = vmatpush.bf16.msra.mxu2 %v1296_v6  ;;  %v1751_v11 = vld [vmem:[#allocation12] sm:$0xff]  ;;  %v1756_v13 = vld [vmem:[#allocation14] sm:$0xff] }
  0x28   :  { %193 = vmatpush.bf16.msra.mxu0 %v1291_v2  ;;  %294 = vmatpush.bf16.msra.mxu3 %v1743_v3 }
  0x29   :  { %223 = vmatpush.bf16.msra.mxu1 %v1293_v7 }
  0x2b   :  { %1201 = vmatmul.msk.bf16.vlgmr.msra.gmra.mxu0 %vm182_vm0, %v1290_v8  ;;  %295 = vmatmul.bf16.vlgmr.msra.gmra.mxu3 %v1638_v12 }
  0x2c   :  { %318 = vmatpush.bf16.msrb.mxu0 %v1745_v5  ;;  %422 = vmatpush.bf16.msrb.mxu3 %v1745_v5 }
  0x2d   :  { %343 = vmatpush.bf16.msrb.mxu1 %v1748_v9  ;;  %253 = vmatpush.bf16.msra.mxu2 %v1295_v10 }
  0x2e   :  { %1210 = vmatmul.msk.bf16.vlgmr.msra.gmra.mxu1 %vm182_vm0, %v1290_v8 }
  0x30   :  { %319 = vmatpush.bf16.msrb.mxu0 %v1751_v11  ;;  %1219 = vmatmul.msk.bf16.vlgmr.msra.gmra.mxu2 %vm182_vm0, %v1290_v8 }
  0x31   :  { %409 = vmatpush.bf16.msrb.mxu2 %v1740_v1  ;;  %423 = vmatpush.bf16.msrb.mxu3 %v1751_v11 }
  0x32   :  { %344 = vmatpush.bf16.msrb.mxu1 %v1756_v13 }
  0x34   :  { %435 = vmatpush.bf16.msra.mxu0 %v1748_v9 }
  0x35   :  { %541 = vmatpush.bf16.msra.mxu3 %v1748_v9  ;;  %410 = vmatpush.bf16.msrb.mxu2 %v1743_v3 }
  0x36   :  { %515 = vmatpush.bf16.msra.mxu1 %v1740_v1 }
  0x38   :  { %436 = vmatpush.bf16.msra.mxu0 %v1756_v13 }
  0x39   :  { %528 = vmatpush.bf16.msra.mxu2 %v1745_v5  ;;  %542 = vmatpush.bf16.msra.mxu3 %v1756_v13 }
  0x3a   :  { %516 = vmatpush.bf16.msra.mxu1 %v1743_v3 }
  0x3b   :  { %320 = vmatmul.bf16.vlgmr.msrb.gmra.mxu0 %v1638_v12 }
  0x3c   :  { %621 = vmatpush.bf16.msrb.mxu0 %v1740_v1 }
  0x3d   :  { %529 = vmatpush.bf16.msra.mxu2 %v1751_v11 }
  0x3e   :  { %345 = vmatmul.bf16.vlgmr.msrb.gmra.mxu1 %v1638_v12 }
  0x3f   :  { %634 = vmatpush.bf16.msrb.mxu1 %v1745_v5 }
  0x40   :  { %622 = vmatpush.bf16.msrb.mxu0 %v1743_v3 }
  0x43   :  { %635 = vmatpush.bf16.msrb.mxu1 %v1751_v11 }
  0xa8   :  { %v1777_v14 = vpop.f32.mrf.mxu0 }
  0xab   :  { %v1779_v15 = vpop.f32.mrf.mxu1 }
  0xae   :  { %v296_v16 = vpop.f32.mrf.mxu3 }
  0xaf   :  { %v350_v17 = vadd.f32 %v296_v16, %v1777_v14 }
  0xb0   :  { %v1782_v18 = vpop.f32.mrf.mxu0 }
  0xb1   :  { %v1244_v19 = vmul.f32 -1.442695, %v350_v17 }
  0xb3   :  { %v1784_v20 = vpop.f32.mrf.mxu1  ;;  %1320 = vpow2.f32 %v1244_v19  ;;  %v1787_v45 = vpop.f32.mrf.mxu2 }
  0xb6   :  { %v298_v21 = vpop.f32.mrf.mxu3 }
  0xb8   :  { %v321_v22 = vpop.f32.mrf.mxu0 }
  0xb9   :  { %v1321_v23 = vpop.eup %1320  ;;  %v370_v24 = vadd.f32 %v321_v22, %v1779_v15 }
  0xba   :  { %v354_v25 = vadd.f32 1.0, %v1321_v23 }
  0xbb   :  { %v346_v26 = vpop.f32.mrf.mxu1  ;;  %v1245_v27 = vmul.f32 -1.442695, %v370_v24  ;;  %v1805_v61 = vpop.f32.mrf.mxu2 }
  0xbc   :  { %1322 = vrcp.f32 %v354_v25  ;;  %v366_v35 = vand.u32 2147483648, %v354_v25  ;;  %v364_v37 = vand.u32 2147483647, %v354_v25  ;;  %vm360_vm2 = vweird.f32 %v354_v25 }
  0xbd   :  { %1324 = vpow2.f32 %v1245_v27 }
  0xbe   :  { %v367_v39 = vor.u32 1.1754944e-38, %v366_v35  ;;  %vm365_vm4 = vcmp.eq.f32.partialorder %v364_v37, 8.507059e+37 }
  0xc0   :  { %v323_v28 = vpop.f32.mrf.mxu0 }
  0xc2   :  { %v1323_v29 = vpop.eup %1322 }
  0xc3   :  { %v348_v30 = vpop.f32.mrf.mxu1  ;;  %v1325_v31 = vpop.eup %1324  ;;  %v356_v32 = vmul.f32 %v1323_v29, %v354_v25  ;;  %vm361_vm1 = vweird.f32 %v1323_v29 }
  0xc4   :  { %v374_v33 = vadd.f32 1.0, %v1325_v31  ;;  %vm362_vm3 = vmor %vm360_vm2, %vm361_vm1 }
  0xc5   :  { %v357_v34 = vsub.f32 1.0, %v356_v32 }
  0xc6   :  { %1326 = vrcp.f32 %v374_v33  ;;  %v386_v48 = vand.u32 2147483648, %v374_v33  ;;  %v384_v50 = vand.u32 2147483647, %v374_v33  ;;  %vm380_vm6 = vweird.f32 %v374_v33 }
  0xc7   :  { %v358_v36 = vmul.f32 %v1323_v29, %v357_v34 }
  0xc8   :  { %v387_v52 = vor.u32 1.1754944e-38, %v386_v48  ;;  %vm385_vm8 = vcmp.eq.f32.partialorder %v384_v50, 8.507059e+37 }
  0xc9   :  { %v359_v38 = vadd.f32 %v1323_v29, %v358_v36 }
  0xcb   :  { %v363_v40 = vsel %vm362_vm3, %v1323_v29, %v359_v38  ;;  %vm501_vm3 = vcmask 257026  }
  0xcc   :  { %v1327_v41 = vpop.eup %1326  ;;  %v368_v42 = vsel %vm365_vm4, %v367_v39, %v363_v40 }
  0xcd   :  { %v376_v43 = vmul.f32 %v1327_v41, %v374_v33  ;;  %v390_v44 = vmul.f32 %v368_v42, %v346_v26  ;;  %vm381_vm5 = vweird.f32 %v1327_v41 }
  0xce   :  { %vm382_vm7 = vmor %vm380_vm6, %vm381_vm5 }
  0xcf   :  { %v377_v46 = vsub.f32 1.0, %v376_v43  ;;  %v391_v47 = vadd.f32 %v390_v44, %v1787_v45 }
  0xd1   :  { %v378_v49 = vmul.f32 %v1327_v41, %v377_v46  ;;  %1328 = vtanh.f32 %v391_v47 }
  0xd3   :  { %v379_v51 = vadd.f32 %v1327_v41, %v378_v49 }
  0xd5   :  { %v383_v53 = vsel %vm382_vm7, %v1327_v41, %v379_v51 }
  0xd6   :  { %v388_v54 = vsel %vm385_vm8, %v387_v52, %v383_v53 }
  0xd7   :  { %v1329_v55 = vpop.eup %1328  ;;  %v393_v56 = vsub.f32 1.0, %v388_v54  ;;  %v395_v58 = vmul.f32 0.0, %v388_v54 }
  0xd9   :  { %v394_v57 = vmul.f32 %v1329_v55, %v393_v56 }
  0xdb   :  { %v1790_v59 = vadd.f32 %v395_v58, %v394_v57 }
  0xdd   :  { %398 = vst.msk [vmem:[#allocation2] sm:$0x3] %vm397_vm9, %v1790_v59  ;;  %v399_v60 = vpack.c.bf16 %v1790_v59, %v1790_v59  ;;  %v497_v48 = vrot.slane %v1790_v59, 6 }
  0xdf   :  { %1246 = vmatmul.msk.bf16.vlgmr.msrb.gmra.mxu2 %vm182_vm0, %v399_v60  ;;  %1247 = vmatmul.msk.bf16.vlgmr.msrb.gmra.mxu3 %vm182_vm0, %v399_v60 }
  0xe0   :  { %1248 = vmatmul.msk.bf16.vlgmr.msra.gmra.mxu0 %vm182_vm0, %v399_v60  ;;  %647 = vmatpush.bf16.msrb.mxu2 %v1748_v9 }
  0xe1   :  { %727 = vmatpush.bf16.msrb.mxu3 %v1740_v1  ;;  %740 = vmatpush.bf16.msra.mxu0 %v1745_v5 }
  0xe4   :  { %648 = vmatpush.bf16.msrb.mxu2 %v1756_v13 }
  0xe5   :  { %728 = vmatpush.bf16.msrb.mxu3 %v1743_v3  ;;  %741 = vmatpush.bf16.msra.mxu0 %v1751_v11 }
 0x15d   :  { %v438_v62 = vpop.f32.mrf.mxu0 }
 0x15e   :  { %v489_v36 = vrot.slane %v438_v62, 6 }
 0x162   :  { %v412_v63 = vpop.f32.mrf.mxu2  ;;  %v425_v0 = vpop.f32.mrf.mxu3 }
 0x163   :  { %v443_v2 = vrot.slane %v412_v63, 6  ;;  %v466_v4 = vrot.slane %v425_v0, 6 }
 0x165   :  { %v445_v6 = vadd.f32 %v443_v2, %v1777_v14  ;;  %v468_v7 = vadd.f32 %v466_v4, %v1779_v15  ;;  %v440_v8 = vpop.f32.mrf.mxu0 }
 0x167   :  { %v1249_v10 = vmul.f32 -1.442695, %v445_v6  ;;  %v1250_v12 = vmul.f32 -1.442695, %v468_v7 }
 0x169   :  { %1330 = vpow2.f32 %v1249_v10 }
 0x16a   :  { %1332 = vpow2.f32 %v1250_v12  ;;  %v414_v16 = vpop.f32.mrf.mxu2  ;;  %v427_v17 = vpop.f32.mrf.mxu3 }
 0x16f   :  { %v1331_v19 = vpop.eup %1330 }
 0x170   :  { %v1333_v21 = vpop.eup %1332  ;;  %v449_v22 = vadd.f32 1.0, %v1331_v19 }
 0x171   :  { %v472_v23 = vadd.f32 1.0, %v1333_v21 }
 0x172   :  { %1334 = vrcp.f32 %v449_v22  ;;  %v461_v29 = vand.u32 2147483648, %v449_v22  ;;  %v459_v32 = vand.u32 2147483647, %v449_v22  ;;  %vm455_vm11 = vweird.f32 %v449_v22 }
 0x173   :  { %1336 = vrcp.f32 %v472_v23  ;;  %v484_v41 = vand.u32 2147483648, %v472_v23  ;;  %vm478_vm15 = vweird.f32 %v472_v23  ;;  %v482_v42 = vand.u32 2147483647, %v472_v23 }
 0x174   :  { %v462_v35 = vor.u32 1.1754944e-38, %v461_v29  ;;  %vm460_vm13 = vcmp.eq.f32.partialorder %v459_v32, 8.507059e+37 }
 0x175   :  { %v485_v46 = vor.u32 1.1754944e-38, %v484_v41  ;;  %vm483_vm2 = vcmp.eq.f32.partialorder %v482_v42, 8.507059e+37 }
 0x178   :  { %v1335_v24 = vpop.eup %1334 }
 0x179   :  { %v1337_v25 = vpop.eup %1336  ;;  %v451_v26 = vmul.f32 %v1335_v24, %v449_v22  ;;  %vm456_vm10 = vweird.f32 %v1335_v24 }
 0x17a   :  { %v474_v27 = vmul.f32 %v1337_v25, %v472_v23  ;;  %vm457_vm12 = vmor %vm455_vm11, %vm456_vm10  ;;  %vm479_vm14 = vweird.f32 %v1337_v25 }
 0x17b   :  { %v452_v28 = vsub.f32 1.0, %v451_v26  ;;  %vm480_vm1 = vmor %vm478_vm15, %vm479_vm14 }
 0x17c   :  { %v475_v30 = vsub.f32 1.0, %v474_v27 }
 0x17d   :  { %v453_v31 = vmul.f32 %v1335_v24, %v452_v28 }
 0x17e   :  { %v476_v33 = vmul.f32 %v1337_v25, %v475_v30 }
 0x17f   :  { %v454_v34 = vadd.f32 %v1335_v24, %v453_v31 }
 0x180   :  { %v477_v39 = vadd.f32 %v1337_v25, %v476_v33 }
 0x181   :  { %v458_v37 = vsel %vm457_vm12, %v1335_v24, %v454_v34 }
 0x182   :  { %v463_v38 = vsel %vm460_vm13, %v462_v35, %v458_v37  ;;  %v481_v44 = vsel %vm480_vm1, %v1337_v25, %v477_v39  ;;  %vm607_vm13 = vcmask 259076  }
 0x183   :  { %v491_v40 = vmul.f32 %v489_v36, %v463_v38  ;;  %v486_v47 = vsel %vm483_vm2, %v485_v46, %v481_v44 }
 0x184   :  { %v494_v49 = vsub.f32 1.0, %v486_v47  ;;  %v499_v52 = vmul.f32 %v497_v48, %v486_v47 }
 0x185   :  { %v492_v43 = vadd.f32 %v491_v40, %v1787_v45 }
 0x187   :  { %1338 = vtanh.f32 %v492_v43 }
 0x18d   :  { %v1339_v50 = vpop.eup %1338 }
 0x18e   :  { %v495_v51 = vmul.f32 %v1339_v50, %v494_v49 }
 0x190   :  { %v1811_v53 = vadd.f32 %v499_v52, %v495_v51 }
 0x192   :  { %502 = vst.msk [vmem:[#allocation2] sm:$0xc] %vm501_vm3, %v1811_v53  ;;  %v503_v54 = vpack.c.bf16 %v1811_v53, %v1811_v53  ;;  %v603_v43 = vrot.slane %v1811_v53, 6 }
 0x194   :  { %v505_v55 = vrot.slane %v503_v54, 1 }
 0x196   :  { %1251 = vmatmul.msk.bf16.vlgmr.msra.gmra.mxu1 %vm182_vm0, %v505_v55  ;;  %1252 = vmatmul.msk.bf16.vlgmr.msra.gmra.mxu2 %vm182_vm0, %v505_v55 }
 0x197   :  { %1253 = vmatmul.msk.bf16.vlgmr.msra.gmra.mxu3 %vm182_vm0, %v505_v55  ;;  %753 = vmatpush.bf16.msra.mxu1 %v1748_v9 }
 0x198   :  { %821 = vmatpush.bf16.msra.mxu2 %v1740_v1  ;;  %834 = vmatpush.bf16.msra.mxu3 %v1745_v5 }
 0x19b   :  { %754 = vmatpush.bf16.msra.mxu1 %v1756_v13 }
 0x19c   :  { %822 = vmatpush.bf16.msra.mxu2 %v1743_v3  ;;  %835 = vmatpush.bf16.msra.mxu3 %v1751_v11 }
 0x213   :  { %v518_v56 = vpop.f32.mrf.mxu1 }
 0x214   :  { %v549_v57 = vrot.slane %v518_v56, 4 }
 0x216   :  { %v551_v58 = vadd.f32 %v549_v57, %v1777_v14 }
 0x218   :  { %v1254_v59 = vmul.f32 -1.442695, %v551_v58 }
 0x219   :  { %v531_v60 = vpop.f32.mrf.mxu2 }
 0x21a   :  { %1340 = vpow2.f32 %v1254_v59  ;;  %v572_v62 = vrot.slane %v531_v60, 4  ;;  %v544_v63 = vpop.f32.mrf.mxu3 }
 0x21b   :  { %v520_v0 = vpop.f32.mrf.mxu1  ;;  %v595_v31 = vrot.slane %v544_v63, 4 }
 0x21c   :  { %v574_v2 = vadd.f32 %v572_v62, %v1779_v15 }
 0x21e   :  { %v1255_v4 = vmul.f32 -1.442695, %v574_v2 }
 0x220   :  { %v1341_v6 = vpop.eup %1340  ;;  %1342 = vpow2.f32 %v1255_v4 }
 0x221   :  { %v555_v7 = vadd.f32 1.0, %v1341_v6  ;;  %v533_v8 = vpop.f32.mrf.mxu2 }
 0x222   :  { %v546_v10 = vpop.f32.mrf.mxu3 }
 0x223   :  { %1344 = vrcp.f32 %v555_v7  ;;  %v567_v22 = vand.u32 2147483648, %v555_v7  ;;  %v565_v24 = vand.u32 2147483647, %v555_v7  ;;  %vm561_vm5 = vweird.f32 %v555_v7 }
 0x225   :  { %v568_v28 = vor.u32 1.1754944e-38, %v567_v22  ;;  %vm566_vm7 = vcmp.eq.f32.partialorder %v565_v24, 8.507059e+37 }
 0x226   :  { %v1343_v12 = vpop.eup %1342 }
 0x227   :  { %v578_v16 = vadd.f32 1.0, %v1343_v12 }
 0x229   :  { %v1345_v17 = vpop.eup %1344  ;;  %1346 = vrcp.f32 %v578_v16  ;;  %v590_v34 = vand.u32 2147483648, %v578_v16  ;;  %v588_v36 = vand.u32 2147483647, %v578_v16  ;;  %vm584_vm10 = vweird.f32 %v578_v16 }
 0x22a   :  { %v557_v19 = vmul.f32 %v1345_v17, %v555_v7  ;;  %vm562_vm4 = vweird.f32 %v1345_v17 }
 0x22b   :  { %vm563_vm6 = vmor %vm561_vm5, %vm562_vm4  ;;  %v591_v39 = vor.u32 1.1754944e-38, %v590_v34  ;;  %vm589_vm12 = vcmp.eq.f32.partialorder %v588_v36, 8.507059e+37 }
 0x22c   :  { %v558_v21 = vsub.f32 1.0, %v557_v19 }
 0x22e   :  { %v559_v23 = vmul.f32 %v1345_v17, %v558_v21 }
 0x22f   :  { %v1347_v25 = vpop.eup %1346 }
 0x230   :  { %v580_v26 = vmul.f32 %v1347_v25, %v578_v16  ;;  %v560_v27 = vadd.f32 %v1345_v17, %v559_v23  ;;  %vm585_vm8 = vweird.f32 %v1347_v25 }
 0x231   :  { %vm586_vm11 = vmor %vm584_vm10, %vm585_vm8  ;;  %vm713_vm8 = vcmask 261126  }
 0x232   :  { %v581_v29 = vsub.f32 1.0, %v580_v26  ;;  %v564_v30 = vsel %vm563_vm6, %v1345_v17, %v560_v27 }
 0x233   :  { %v569_v32 = vsel %vm566_vm7, %v568_v28, %v564_v30 }
 0x234   :  { %v582_v33 = vmul.f32 %v1347_v25, %v581_v29  ;;  %v597_v35 = vmul.f32 %v595_v31, %v569_v32 }
 0x236   :  { %v583_v37 = vadd.f32 %v1347_v25, %v582_v33  ;;  %v598_v38 = vadd.f32 %v597_v35, %v1787_v45 }
 0x238   :  { %v587_v40 = vsel %vm586_vm11, %v1347_v25, %v583_v37  ;;  %1348 = vtanh.f32 %v598_v38 }
 0x239   :  { %v592_v41 = vsel %vm589_vm12, %v591_v39, %v587_v40 }
 0x23a   :  { %v600_v42 = vsub.f32 1.0, %v592_v41  ;;  %v605_v47 = vmul.f32 %v603_v43, %v592_v41 }
 0x23e   :  { %v1349_v44 = vpop.eup %1348 }
 0x23f   :  { %v601_v46 = vmul.f32 %v1349_v44, %v600_v42 }
 0x241   :  { %v1830_v48 = vadd.f32 %v605_v47, %v601_v46 }
 0x243   :  { %608 = vst.msk [vmem:[#allocation2] sm:$0x30] %vm607_vm13, %v1830_v48  ;;  %v609_v49 = vpack.c.bf16 %v1830_v48, %v1830_v48  ;;  %v709_v36 = vrot.slane %v1830_v48, 6 }
 0x245   :  { %v611_v50 = vrot.slane %v609_v49, 2 }
 0x247   :  { %1256 = vmatmul.msk.bf16.vlgmr.msrb.gmra.mxu0 %vm182_vm0, %v611_v50  ;;  %1257 = vmatmul.msk.bf16.vlgmr.msrb.gmra.mxu1 %vm182_vm0, %v611_v50 }
 0x248   :  { %1258 = vmatmul.msk.bf16.vlgmr.msrb.gmra.mxu2 %vm182_vm0, %v611_v50  ;;  %847 = vmatpush.bf16.msrb.mxu0 %v1748_v9 }
 0x249   :  { %926 = vmatpush.bf16.msrb.mxu1 %v1740_v1  ;;  %939 = vmatpush.bf16.msrb.mxu2 %v1745_v5 }
 0x24c   :  { %848 = vmatpush.bf16.msrb.mxu0 %v1756_v13 }
 0x24d   :  { %927 = vmatpush.bf16.msrb.mxu1 %v1743_v3  ;;  %940 = vmatpush.bf16.msrb.mxu2 %v1751_v11 }
 0x2c4   :  { %v624_v51 = vpop.f32.mrf.mxu0  ;;  %v637_v52 = vpop.f32.mrf.mxu1 }
 0x2c5   :  { %v655_v53 = vrot.slane %v624_v51, 2  ;;  %v678_v54 = vrot.slane %v637_v52, 2 }
 0x2c7   :  { %v657_v55 = vadd.f32 %v655_v53, %v1777_v14  ;;  %v680_v56 = vadd.f32 %v678_v54, %v1779_v15 }
 0x2c9   :  { %v1259_v57 = vmul.f32 -1.442695, %v657_v55  ;;  %v1260_v58 = vmul.f32 -1.442695, %v680_v56 }
 0x2cb   :  { %1350 = vpow2.f32 %v1259_v57  ;;  %v650_v59 = vpop.f32.mrf.mxu2 }
 0x2cc   :  { %1352 = vpow2.f32 %v1260_v58  ;;  %v626_v60 = vpop.f32.mrf.mxu0  ;;  %v639_v62 = vpop.f32.mrf.mxu1  ;;  %v701_v25 = vrot.slane %v650_v59, 2 }
 0x2d1   :  { %v1351_v63 = vpop.eup %1350 }
 0x2d2   :  { %v1353_v0 = vpop.eup %1352  ;;  %v661_v2 = vadd.f32 1.0, %v1351_v63 }
 0x2d3   :  { %v684_v4 = vadd.f32 1.0, %v1353_v0  ;;  %v652_v6 = vpop.f32.mrf.mxu2 }
 0x2d4   :  { %1354 = vrcp.f32 %v661_v2  ;;  %v673_v16 = vand.u32 2147483648, %v661_v2  ;;  %v671_v19 = vand.u32 2147483647, %v661_v2  ;;  %vm667_vm15 = vweird.f32 %v661_v2 }
 0x2d5   :  { %1356 = vrcp.f32 %v684_v4  ;;  %v696_v28 = vand.u32 2147483648, %v684_v4  ;;  %vm690_vm5 = vweird.f32 %v684_v4  ;;  %v694_v30 = vand.u32 2147483647, %v684_v4 }
 0x2d6   :  { %v674_v23 = vor.u32 1.1754944e-38, %v673_v16  ;;  %vm672_vm2 = vcmp.eq.f32.partialorder %v671_v19, 8.507059e+37 }
 0x2d7   :  { %v697_v33 = vor.u32 1.1754944e-38, %v696_v28  ;;  %vm695_vm7 = vcmp.eq.f32.partialorder %v694_v30, 8.507059e+37 }
 0x2da   :  { %v1355_v7 = vpop.eup %1354 }
 0x2db   :  { %v1357_v8 = vpop.eup %1356  ;;  %v663_v10 = vmul.f32 %v1355_v7, %v661_v2  ;;  %vm668_vm14 = vweird.f32 %v1355_v7 }
 0x2dc   :  { %v686_v14 = vmul.f32 %v1357_v8, %v684_v4  ;;  %vm669_vm1 = vmor %vm667_vm15, %vm668_vm14  ;;  %vm691_vm4 = vweird.f32 %v1357_v8 }
 0x2dd   :  { %v664_v12 = vsub.f32 1.0, %v663_v10  ;;  %vm692_vm6 = vmor %vm690_vm5, %vm691_vm4 }
 0x2de   :  { %v687_v15 = vsub.f32 1.0, %v686_v14 }
 0x2df   :  { %v665_v17 = vmul.f32 %v1355_v7, %v664_v12 }
 0x2e0   :  { %v688_v21 = vmul.f32 %v1357_v8, %v687_v15 }
 0x2e1   :  { %v666_v22 = vadd.f32 %v1355_v7, %v665_v17 }
 0x2e2   :  { %v689_v27 = vadd.f32 %v1357_v8, %v688_v21 }
 0x2e3   :  { %v670_v24 = vsel %vm669_vm1, %v1355_v7, %v666_v22 }
 0x2e4   :  { %v675_v26 = vsel %vm672_vm2, %v674_v23, %v670_v24  ;;  %v693_v32 = vsel %vm692_vm6, %v1357_v8, %v689_v27 }
 0x2e5   :  { %v703_v29 = vmul.f32 %v701_v25, %v675_v26  ;;  %v698_v34 = vsel %vm695_vm7, %v697_v33, %v693_v32 }
 0x2e6   :  { %v706_v35 = vsub.f32 1.0, %v698_v34  ;;  %v711_v39 = vmul.f32 %v709_v36, %v698_v34 }
 0x2e7   :  { %v704_v31 = vadd.f32 %v703_v29, %v1787_v45 }
 0x2e9   :  { %1358 = vtanh.f32 %v704_v31 }
 0x2ef   :  { %v1359_v37 = vpop.eup %1358 }
 0x2f0   :  { %v707_v38 = vmul.f32 %v1359_v37, %v706_v35 }
 0x2f2   :  { %v1849_v40 = vadd.f32 %v711_v39, %v707_v38 }
 0x2f4   :  { %714 = vst.msk [vmem:[#allocation2] sm:$0xc0] %vm713_vm8, %v1849_v40  ;;  %v715_v45 = vpack.c.bf16 %v1849_v40, %v1849_v40  ;;  %v806_v19 = vrot.slane %v1849_v40, 6 }
 0x2f6   :  { %v717_v41 = vrot.slane %v715_v45, 3 }
 0x2f8   :  { %1261 = vmatmul.msk.bf16.vlgmr.msrb.gmra.mxu3 %vm182_vm0, %v717_v41  ;;  %1262 = vmatmul.msk.bf16.vlgmr.msra.gmra.mxu0 %vm182_vm0, %v717_v41 }
 0x2f9   :  { %1263 = vmatmul.msk.bf16.vlgmr.msra.gmra.mxu1 %vm182_vm0, %v717_v41  ;;  %952 = vmatpush.bf16.msrb.mxu3 %v1748_v9 }
 0x2fa   :  { %1031 = vmatpush.bf16.msra.mxu0 %v1740_v1  ;;  %1044 = vmatpush.bf16.msra.mxu1 %v1745_v5 }
 0x2fd   :  { %953 = vmatpush.bf16.msrb.mxu3 %v1756_v13 }
 0x2fe   :  { %1032 = vmatpush.bf16.msra.mxu0 %v1743_v3  ;;  %1045 = vmatpush.bf16.msra.mxu1 %v1751_v11 }
 0x375   :  { %v743_v42 = vpop.f32.mrf.mxu0 }
 0x376   :  { %v780_v43 = vadd.f32 %v743_v42, %v1784_v20  ;;  %v756_v44 = vpop.f32.mrf.mxu1 }
 0x378   :  { %v1265_v46 = vmul.f32 -1.442695, %v780_v43 }
 0x37a   :  { %1360 = vpow2.f32 %v1265_v46 }
 0x37b   :  { %v730_v47 = vpop.f32.mrf.mxu3 }
 0x37c   :  { %v760_v48 = vadd.f32 %v730_v47, %v1782_v18 }
 0x37d   :  { %v745_v49 = vpop.f32.mrf.mxu0 }
 0x37e   :  { %v1264_v50 = vmul.f32 -1.442695, %v760_v48  ;;  %v758_v1 = vpop.f32.mrf.mxu1 }
 0x380   :  { %v1361_v51 = vpop.eup %1360  ;;  %1362 = vpow2.f32 %v1264_v50 }
 0x381   :  { %v784_v5 = vadd.f32 1.0, %v1361_v51 }
 0x383   :  { %v732_v52 = vpop.f32.mrf.mxu3  ;;  %1364 = vrcp.f32 %v784_v5  ;;  %v796_v8 = vand.u32 2147483648, %v784_v5  ;;  %vm790_vm1 = vweird.f32 %v784_v5  ;;  %v794_v14 = vand.u32 2147483647, %v784_v5 }
 0x385   :  { %v797_v16 = vor.u32 1.1754944e-38, %v796_v8  ;;  %vm795_vm4 = vcmp.eq.f32.partialorder %v794_v14, 8.507059e+37 }
 0x386   :  { %v1363_v3 = vpop.eup %1362 }
 0x387   :  { %v764_v53 = vadd.f32 1.0, %v1363_v3 }
 0x389   :  { %1366 = vrcp.f32 %v764_v53  ;;  %v1365_v11 = vpop.eup %1364  ;;  %v776_v59 = vand.u32 2147483648, %v764_v53  ;;  %v774_v62 = vand.u32 2147483647, %v764_v53  ;;  %vm770_vm11 = vweird.f32 %v764_v53 }
 0x38a   :  { %v786_v54 = vmul.f32 %v1365_v11, %v784_v5  ;;  %vm791_vm15 = vweird.f32 %v1365_v11 }
 0x38b   :  { %v777_v2 = vor.u32 1.1754944e-38, %v776_v59  ;;  %vm775_vm14 = vcmp.eq.f32.partialorder %v774_v62, 8.507059e+37  ;;  %vm792_vm2 = vmor %vm790_vm1, %vm791_vm15 }
 0x38c   :  { %v787_v57 = vsub.f32 1.0, %v786_v54 }
 0x38e   :  { %v788_v63 = vmul.f32 %v1365_v11, %v787_v57 }
 0x38f   :  { %v1367_v55 = vpop.eup %1366 }
 0x390   :  { %v766_v56 = vmul.f32 %v1367_v55, %v764_v53  ;;  %vm771_vm10 = vweird.f32 %v1367_v55  ;;  %v789_v6 = vadd.f32 %v1365_v11, %v788_v63 }
 0x391   :  { %vm772_vm12 = vmor %vm770_vm11, %vm771_vm10 }
 0x392   :  { %v767_v58 = vsub.f32 1.0, %v766_v56  ;;  %v793_v15 = vsel %vm792_vm2, %v1365_v11, %v789_v6 }
 0x393   :  { %v798_v17 = vsel %vm795_vm4, %v797_v16, %v793_v15 }
 0x394   :  { %v768_v60 = vmul.f32 %v1367_v55, %v767_v58  ;;  %v803_v21 = vsub.f32 1.0, %v798_v17  ;;  %v808_v24 = vmul.f32 %v806_v19, %v798_v17 }
 0x396   :  { %v769_v0 = vadd.f32 %v1367_v55, %v768_v60 }
 0x398   :  { %v773_v4 = vsel %vm772_vm12, %v1367_v55, %v769_v0 }
 0x399   :  { %v778_v7 = vsel %vm775_vm14, %v777_v2, %v773_v4 }
 0x39a   :  { %v800_v10 = vmul.f32 %v778_v7, %v756_v44 }
 0x39c   :  { %v801_v12 = vadd.f32 %v800_v10, %v1805_v61 }
 0x39e   :  { %1368 = vtanh.f32 %v801_v12 }
 0x3a4   :  { %v1369_v22 = vpop.eup %1368 }
 0x3a5   :  { %v804_v23 = vmul.f32 %v1369_v22, %v803_v21 }
 0x3a7   :  { %v1868_v25 = vadd.f32 %v808_v24, %v804_v23 }
 0x3a9   :  { %810 = vst.msk [vmem:[#allocation2 + $0x8] sm:$0x3] %vm397_vm9, %v1868_v25  ;;  %v811_v26 = vpack.c.bf16 %v1868_v25, %v1868_v25  ;;  %v909_v62 = vrot.slane %v1868_v25, 6 }
 0x3ab   :  { %1266 = vmatmul.msk.bf16.vlgmr.msra.gmra.mxu2 %vm182_vm0, %v811_v26  ;;  %1267 = vmatmul.msk.bf16.vlgmr.msra.gmra.mxu3 %vm182_vm0, %v811_v26 }
 0x3ac   :  { %1268 = vmatmul.msk.bf16.vlgmr.msrb.gmra.mxu0 %vm182_vm0, %v811_v26  ;;  %1057 = vmatpush.bf16.msra.mxu2 %v1748_v9 }
 0x3b0   :  { %1058 = vmatpush.bf16.msra.mxu2 %v1756_v13 }
 0x429   :  { %v850_v27 = vpop.f32.mrf.mxu0 }
 0x42a   :  { %v901_v5 = vrot.slane %v850_v27, 6 }
 0x42e   :  { %v824_v28 = vpop.f32.mrf.mxu2  ;;  %v837_v29 = vpop.f32.mrf.mxu3 }
 0x42f   :  { %v855_v30 = vrot.slane %v824_v28, 6  ;;  %v878_v31 = vrot.slane %v837_v29, 6 }
 0x431   :  { %v857_v32 = vadd.f32 %v855_v30, %v1782_v18  ;;  %v880_v33 = vadd.f32 %v878_v31, %v1784_v20  ;;  %v852_v34 = vpop.f32.mrf.mxu0 }
 0x433   :  { %v1269_v35 = vmul.f32 -1.442695, %v857_v32  ;;  %v1270_v36 = vmul.f32 -1.442695, %v880_v33 }
 0x435   :  { %1370 = vpow2.f32 %v1269_v35 }
 0x436   :  { %1372 = vpow2.f32 %v1270_v36  ;;  %v826_v37 = vpop.f32.mrf.mxu2  ;;  %v839_v38 = vpop.f32.mrf.mxu3 }
 0x43b   :  { %v1371_v39 = vpop.eup %1370 }
 0x43c   :  { %v1373_v9 = vpop.eup %1372  ;;  %v861_v40 = vadd.f32 1.0, %v1371_v39 }
 0x43d   :  { %v884_v13 = vadd.f32 1.0, %v1373_v9 }
 0x43e   :  { %1374 = vrcp.f32 %v861_v40  ;;  %v873_v46 = vand.u32 2147483648, %v861_v40  ;;  %v871_v49 = vand.u32 2147483647, %v861_v40  ;;  %vm867_vm5 = vweird.f32 %v861_v40 }
 0x43f   :  { %1376 = vrcp.f32 %v884_v13  ;;  %v896_v54 = vand.u32 2147483648, %v884_v13  ;;  %vm890_vm11 = vweird.f32 %v884_v13  ;;  %v894_v55 = vand.u32 2147483647, %v884_v13 }
 0x440   :  { %v874_v51 = vor.u32 1.1754944e-38, %v873_v46  ;;  %vm872_vm7 = vcmp.eq.f32.partialorder %v871_v49, 8.507059e+37 }
 0x441   :  { %v897_v58 = vor.u32 1.1754944e-38, %v896_v54  ;;  %vm895_vm14 = vcmp.eq.f32.partialorder %v894_v55, 8.507059e+37 }
 0x444   :  { %v1375_v45 = vpop.eup %1374 }
 0x445   :  { %v1377_v41 = vpop.eup %1376  ;;  %v863_v42 = vmul.f32 %v1375_v45, %v861_v40  ;;  %vm868_vm9 = vweird.f32 %v1375_v45 }
 0x446   :  { %v886_v43 = vmul.f32 %v1377_v41, %v884_v13  ;;  %vm869_vm6 = vmor %vm867_vm5, %vm868_vm9  ;;  %vm891_vm10 = vweird.f32 %v1377_v41 }
 0x447   :  { %v864_v44 = vsub.f32 1.0, %v863_v42  ;;  %vm892_vm12 = vmor %vm890_vm11, %vm891_vm10 }
 0x448   :  { %v887_v47 = vsub.f32 1.0, %v886_v43 }
 0x449   :  { %v865_v48 = vmul.f32 %v1375_v45, %v864_v44 }
 0x44a   :  { %v888_v50 = vmul.f32 %v1377_v41, %v887_v47 }
 0x44b   :  { %v866_v1 = vadd.f32 %v1375_v45, %v865_v48 }
 0x44c   :  { %v889_v53 = vadd.f32 %v1377_v41, %v888_v50 }
 0x44d   :  { %v870_v52 = vsel %vm869_vm6, %v1375_v45, %v866_v1 }
 0x44e   :  { %v875_v3 = vsel %vm872_vm7, %v874_v51, %v870_v52  ;;  %v893_v57 = vsel %vm892_vm12, %v1377_v41, %v889_v53 }
 0x44f   :  { %v903_v11 = vmul.f32 %v901_v5, %v875_v3  ;;  %v898_v59 = vsel %vm895_vm14, %v897_v58, %v893_v57 }
 0x450   :  { %v906_v60 = vsub.f32 1.0, %v898_v59  ;;  %v911_v2 = vmul.f32 %v909_v62, %v898_v59 }
 0x451   :  { %v904_v56 = vadd.f32 %v903_v11, %v1805_v61 }
 0x453   :  { %1378 = vtanh.f32 %v904_v56 }
 0x459   :  { %v1379_v63 = vpop.eup %1378 }
 0x45a   :  { %v907_v0 = vmul.f32 %v1379_v63, %v906_v60 }
 0x45c   :  { %v1883_v4 = vadd.f32 %v911_v2, %v907_v0 }
 0x45e   :  { %913 = vst.msk [vmem:[#allocation2 + $0x8] sm:$0xc] %vm501_vm3, %v1883_v4  ;;  %v914_v6 = vpack.c.bf16 %v1883_v4, %v1883_v4  ;;  %v1014_v1 = vrot.slane %v1883_v4, 6 }
 0x460   :  { %v916_v7 = vrot.slane %v914_v6, 1 }
 0x462   :  { %1271 = vmatmul.msk.bf16.vlgmr.msrb.gmra.mxu1 %vm182_vm0, %v916_v7  ;;  %1272 = vmatmul.msk.bf16.vlgmr.msrb.gmra.mxu2 %vm182_vm0, %v916_v7 }
 0x463   :  { %1273 = vmatmul.msk.bf16.vlgmr.msrb.gmra.mxu3 %vm182_vm0, %v916_v7 }
 0x4df   :  { %v929_v8 = vpop.f32.mrf.mxu1 }
 0x4e0   :  { %v960_v10 = vrot.slane %v929_v8, 4 }
 0x4e2   :  { %v962_v14 = vadd.f32 %v960_v10, %v1782_v18 }
 0x4e4   :  { %v1274_v12 = vmul.f32 -1.442695, %v962_v14  ;;  %v1304_v14 = vld [vmem:[#allocation15 + $0x8] sm:$0xff] }
 0x4e5   :  { %v942_v15 = vpop.f32.mrf.mxu2  ;;  %1156 = vmatpush.bf16.msra.mxu3 %v1304_v14 }
 0x4e6   :  { %1380 = vpow2.f32 %v1274_v12  ;;  %v983_v16 = vrot.slane %v942_v15, 4  ;;  %v955_v17 = vpop.f32.mrf.mxu3  ;;  %v1303_v12 = vld [vmem:[#allocation15] sm:$0xff] }
 0x4e7   :  { %v931_v19 = vpop.f32.mrf.mxu1  ;;  %v1006_v40 = vrot.slane %v955_v17, 4 }
 0x4e8   :  { %v985_v21 = vadd.f32 %v983_v16, %v1784_v20 }
 0x4e9   :  { %1157 = vmatpush.bf16.msra.mxu3 %v1303_v12 }
 0x4ea   :  { %v1275_v22 = vmul.f32 -1.442695, %v985_v21 }
 0x4ec   :  { %v1381_v23 = vpop.eup %1380  ;;  %1382 = vpow2.f32 %v1275_v22 }
 0x4ed   :  { %v966_v24 = vadd.f32 1.0, %v1381_v23  ;;  %v944_v25 = vpop.f32.mrf.mxu2 }
 0x4ee   :  { %v957_v26 = vpop.f32.mrf.mxu3 }
 0x4ef   :  { %1384 = vrcp.f32 %v966_v24  ;;  %v978_v32 = vand.u32 2147483648, %v966_v24  ;;  %v976_v34 = vand.u32 2147483647, %v966_v24  ;;  %vm972_vm15 = vweird.f32 %v966_v24 }
 0x4f1   :  { %v979_v38 = vor.u32 1.1754944e-38, %v978_v32  ;;  %vm977_vm2 = vcmp.eq.f32.partialorder %v976_v34, 8.507059e+37 }
 0x4f2   :  { %v1383_v27 = vpop.eup %1382 }
 0x4f3   :  { %v989_v28 = vadd.f32 1.0, %v1383_v27 }
 0x4f5   :  { %v1385_v29 = vpop.eup %1384  ;;  %1386 = vrcp.f32 %v989_v28  ;;  %v1001_v41 = vand.u32 2147483648, %v989_v28  ;;  %v999_v43 = vand.u32 2147483647, %v989_v28  ;;  %vm995_vm9 = vweird.f32 %v989_v28 }
 0x4f6   :  { %v968_v30 = vmul.f32 %v1385_v29, %v966_v24  ;;  %vm973_vm3 = vweird.f32 %v1385_v29 }
 0x4f7   :  { %vm974_vm1 = vmor %vm972_vm15, %vm973_vm3  ;;  %v1002_v47 = vor.u32 1.1754944e-38, %v1001_v41  ;;  %vm1000_vm6 = vcmp.eq.f32.partialorder %v999_v43, 8.507059e+37  ;;  %v1124_v41 = vld [vmem:[#allocation2] sm:$0xff] }
 0x4f8   :  { %v969_v31 = vsub.f32 1.0, %v968_v30 }
 0x4fa   :  { %v970_v33 = vmul.f32 %v1385_v29, %v969_v31 }
 0x4fb   :  { %v1387_v35 = vpop.eup %1386 }
 0x4fc   :  { %v991_v36 = vmul.f32 %v1387_v35, %v989_v28  ;;  %v971_v37 = vadd.f32 %v1385_v29, %v970_v33  ;;  %vm996_vm4 = vweird.f32 %v1387_v35 }
 0x4fd   :  { %vm997_vm5 = vmor %vm995_vm9, %vm996_vm4 }
 0x4fe   :  { %v992_v39 = vsub.f32 1.0, %v991_v36  ;;  %v975_v9 = vsel %vm974_vm1, %v1385_v29, %v971_v37 }
 0x4ff   :  { %v980_v13 = vsel %vm977_vm2, %v979_v38, %v975_v9 }
 0x500   :  { %v993_v45 = vmul.f32 %v1387_v35, %v992_v39  ;;  %v1008_v42 = vmul.f32 %v1006_v40, %v980_v13 }
 0x502   :  { %v994_v44 = vadd.f32 %v1387_v35, %v993_v45  ;;  %v1009_v46 = vadd.f32 %v1008_v42, %v1805_v61 }
 0x504   :  { %v998_v48 = vsel %vm997_vm5, %v1387_v35, %v994_v44  ;;  %1388 = vtanh.f32 %v1009_v46 }
 0x505   :  { %v1003_v49 = vsel %vm1000_vm6, %v1002_v47, %v998_v48 }
 0x506   :  { %v1011_v50 = vsub.f32 1.0, %v1003_v49  ;;  %v1016_v52 = vmul.f32 %v1014_v1, %v1003_v49 }
 0x50a   :  { %v1389_v51 = vpop.eup %1388 }
 0x50b   :  { %v1012_v5 = vmul.f32 %v1389_v51, %v1011_v50 }
 0x50d   :  { %v1896_v3 = vadd.f32 %v1016_v52, %v1012_v5 }
 0x50f   :  { %1018 = vst.msk [vmem:[#allocation2 + $0x8] sm:$0x30] %vm607_vm13, %v1896_v3  ;;  %v1019_v53 = vpack.c.bf16 %v1896_v3, %v1896_v3  ;;  %v1119_v39 = vrot.slane %v1896_v3, 6 }
 0x511   :  { %v1021_v11 = vrot.slane %v1019_v53, 2 }
 0x513   :  { %1276 = vmatmul.msk.bf16.vlgmr.msra.gmra.mxu0 %vm182_vm0, %v1021_v11  ;;  %1277 = vmatmul.msk.bf16.vlgmr.msra.gmra.mxu1 %vm182_vm0, %v1021_v11 }
 0x514   :  { %1278 = vmatmul.msk.bf16.vlgmr.msra.gmra.mxu2 %vm182_vm0, %v1021_v11 }
 0x590   :  { %v1034_v54 = vpop.f32.mrf.mxu0  ;;  %v1047_v55 = vpop.f32.mrf.mxu1 }
 0x591   :  { %v1065_v56 = vrot.slane %v1034_v54, 2  ;;  %v1088_v57 = vrot.slane %v1047_v55, 2 }
 0x593   :  { %v1067_v58 = vadd.f32 %v1065_v56, %v1782_v18  ;;  %v1090_v59 = vadd.f32 %v1088_v57, %v1784_v20 }
 0x595   :  { %v1279_v60 = vmul.f32 -1.442695, %v1067_v58  ;;  %v1280_v62 = vmul.f32 -1.442695, %v1090_v59 }
 0x597   :  { %1390 = vpow2.f32 %v1279_v60  ;;  %v1060_v63 = vpop.f32.mrf.mxu2 }
 0x598   :  { %1392 = vpow2.f32 %v1280_v62  ;;  %v1036_v0 = vpop.f32.mrf.mxu0  ;;  %v1049_v2 = vpop.f32.mrf.mxu1  ;;  %v1111_v28 = vrot.slane %v1060_v63, 2 }
 0x59d   :  { %v1391_v4 = vpop.eup %1390 }
 0x59e   :  { %v1393_v6 = vpop.eup %1392  ;;  %v1071_v7 = vadd.f32 1.0, %v1391_v4 }
 0x59f   :  { %v1094_v8 = vadd.f32 1.0, %v1393_v6  ;;  %v1062_v10 = vpop.f32.mrf.mxu2 }
 0x5a0   :  { %1394 = vrcp.f32 %v1071_v7  ;;  %v1083_v21 = vand.u32 2147483648, %v1071_v7  ;;  %v1081_v23 = vand.u32 2147483647, %v1071_v7  ;;  %vm1077_vm7 = vweird.f32 %v1071_v7 }
 0x5a1   :  { %1396 = vrcp.f32 %v1094_v8  ;;  %v1106_v31 = vand.u32 2147483648, %v1094_v8  ;;  %vm1100_vm14 = vweird.f32 %v1094_v8  ;;  %v1104_v33 = vand.u32 2147483647, %v1094_v8 }
 0x5a2   :  { %v1084_v26 = vor.u32 1.1754944e-38, %v1083_v21  ;;  %vm1082_vm11 = vcmp.eq.f32.partialorder %v1081_v23, 8.507059e+37 }
 0x5a3   :  { %v1107_v36 = vor.u32 1.1754944e-38, %v1106_v31  ;;  %vm1105_vm15 = vcmp.eq.f32.partialorder %v1104_v33, 8.507059e+37 }
 0x5a6   :  { %v1395_v18 = vpop.eup %1394 }
 0x5a7   :  { %v1397_v20 = vpop.eup %1396  ;;  %v1073_v15 = vmul.f32 %v1395_v18, %v1071_v7  ;;  %vm1078_vm13 = vweird.f32 %v1395_v18 }
 0x5a8   :  { %v1096_v16 = vmul.f32 %v1397_v20, %v1094_v8  ;;  %vm1079_vm10 = vmor %vm1077_vm7, %vm1078_vm13  ;;  %vm1101_vm12 = vweird.f32 %v1397_v20 }
 0x5a9   :  { %v1074_v17 = vsub.f32 1.0, %v1073_v15  ;;  %vm1102_vm3 = vmor %vm1100_vm14, %vm1101_vm12 }
 0x5aa   :  { %v1097_v19 = vsub.f32 1.0, %v1096_v16 }
 0x5ab   :  { %v1075_v22 = vmul.f32 %v1395_v18, %v1074_v17 }
 0x5ac   :  { %v1098_v24 = vmul.f32 %v1397_v20, %v1097_v19 }
 0x5ad   :  { %v1076_v25 = vadd.f32 %v1395_v18, %v1075_v22 }
 0x5ae   :  { %v1099_v30 = vadd.f32 %v1397_v20, %v1098_v24 }
 0x5af   :  { %v1080_v27 = vsel %vm1079_vm10, %v1395_v18, %v1076_v25 }
 0x5b0   :  { %v1085_v29 = vsel %vm1082_vm11, %v1084_v26, %v1080_v27  ;;  %v1103_v35 = vsel %vm1102_vm3, %v1397_v20, %v1099_v30 }
 0x5b1   :  { %v1113_v32 = vmul.f32 %v1111_v28, %v1085_v29  ;;  %v1108_v37 = vsel %vm1105_vm15, %v1107_v36, %v1103_v35 }
 0x5b2   :  { %v1116_v38 = vsub.f32 1.0, %v1108_v37  ;;  %v1121_v13 = vmul.f32 %v1119_v39, %v1108_v37 }
 0x5b3   :  { %v1114_v34 = vadd.f32 %v1113_v32, %v1805_v61  ;;  %v1319_v61 = vld [vmem:[%s1925_s8] ss:$0 sm:$0xff] }
 0x5b5   :  { %1398 = vtanh.f32 %v1114_v34 }
 0x5bb   :  { %v1399_v9 = vpop.eup %1398 }
 0x5bc   :  { %v1117_v40 = vmul.f32 %v1399_v9, %v1116_v38 }
 0x5be   :  { %v1122_v45 = vadd.f32 %v1121_v13, %v1117_v40 }
 0x5c0   :  { %1123 = vst.msk [vmem:[#allocation2 + $0x8] sm:$0xc0] %vm713_vm8, %v1122_v45 }
 0x5c7   :  { %v1125_v42 = vld [vmem:[#allocation2 + $0x8] sm:$0xff] }
 0x5c8   :  { %v1126_v43 = vpack.c.bf16 %v1125_v42, %v1124_v41 }
 0x5ca   :  { %1289 = vmatmul.msk.bf16.vlgmr.msra.gmra.mxu3 %vm182_vm0, %v1126_v43 }
 0x64d   :  { %v1159_v44 = vpop.f32.mrf.mxu3 }
 0x64e   :  { %v1160_v46 = vadd.f32 %v1319_v61, %v1159_v44 }
 0x650   :  { %1164 = vst [vmem:[#allocation17] sm:$0xff] %v1160_v46 }
 0x655   :  { %v1161_v47 = vpop.f32.mrf.mxu3 }
 0x656   :  { %v1162_v48 = vadd.f32 %v1319_v61, %v1161_v47 }
 0x658   :  { %1165 = vst [vmem:[#allocation17 + $0x8] sm:$0xff] %v1162_v48 }
 0x659   :  { %1178 = dma.vmem_to_hbm [thread:$0]  %s1171_s23, 256, %s1173_s26, [#allocation5], %s1640_s27, %s1640_s27, %s1641_s5  }
 0x65a   :  { %1626 = dma.done.wait [#allocation5], 256  }
 0x65b   :  { %1627 = vsyncadd [#allocation5], 4294967040 }
 0x65c   :  { %1183 = vsyncpa [#allocation4], 1 }
 0x65d   :  { %1184 = vsyncpa [#allocation7], 1 }
 0x65e   :  { %1185 = vsyncpa [#allocation10], 1 }
 0x65f   :  { %1186 = vsyncpa [#allocation13], 1 }
 0x660   :  { %1187 = vsyncpa [#allocation16], 1 }
 0x661   :  { %1188 = vsyncpa [#allocation5], 1 }

</bundles_post_ra>
